<compile_context>
chip_gen: v7x
topology: tpu7x:2x2x1
jax: 0.10.0
libtpu: 0.0.40
codegen_flags: <defaults>
</compile_context>

<pallas_src>
import functools

import jax
import jax.numpy as jnp
from jax.experimental import pallas as pl
from jax.experimental.pallas import tpu as pltpu

EPS = 1e-5
LANE = 128


def _round_up(v, m):
    return (v + m - 1) // m * m


# ----------------------------- Pallas kernels ------------------------------

def _conv1_kernel(xph_ref, w_ref, insc_ref, insh_ref, outsc_ref, outsh_ref, o_ref,
                  *, s, Ho, Wo, Cp):
    """relu(bn2(conv3x3_stride_s(relu(bn1(x))))) for one image.

    xph_ref : (1, Hph, Wph, s*s*Cp) raw input, phase-decomposed, sentinel halo (bf16)
    w_ref   : (9, Cp, Cop)          conv1 weights, one (Cin,Cout) slab per tap (bf16)
    insc/insh : (1, 1, s*s*Cp)      folded BN1 scale/shift (f32)
    outsc/outsh : (1, Cop)          folded BN2 scale/shift (f32)
    o_ref   : (1, Ho*Wo, Cop)       activated conv1 output (bf16, lane dense)
    """
    cop = o_ref.shape[-1]
    # Fused BN1 + ReLU1 on the whole per-image block (VPU work, hidden under MXU).
    # Sentinel halo values map to exactly 0 here, reproducing the zero padding
    # that torch's Conv2d applies *after* the BN/ReLU prologue.
    x = xph_ref[0].astype(jnp.float32)
    x = jnp.maximum(x * insc_ref[...] + insh_ref[...], 0.0)

    acc = jnp.zeros((Ho * Wo, cop), jnp.float32)
    # 9 shifted-tap matmuls, fully unrolled (short fixed loop -> LLO visibility).
    for kh in range(3):
        for kw in range(3):
            ph = (kh % s) * s + (kw % s)          # which stride phase
            dh, dw = kh // s, kw // s             # static offset inside that phase
            a = x[dh:dh + Ho, dw:dw + Wo, ph * Cp:(ph + 1) * Cp]
            a = a.reshape(Ho * Wo, Cp).astype(jnp.bfloat16)
            acc = acc + jnp.dot(a, w_ref[kh * 3 + kw],
                                preferred_element_type=jnp.float32)

    # Fused BN2 + ReLU2 epilogue (prologue of the second ConvBlock).
    y = jnp.maximum(acc * outsc_ref[...] + outsh_ref[...], 0.0)
    o_ref[...] = y[None].astype(o_ref.dtype)


def _conv2_kernel(apad_ref, w_ref, xs_ref, ws_ref, o_ref, *, Ho, Wo):
    """conv3x3_stride1(a2) + 1x1-strided-shortcut(x) for one image.

    apad_ref : (1, Ho+2, Wo+2, Cp)  activated, zero-padded conv1 output (bf16)
    w_ref    : (9, Cp, Cop)         conv2 weights per tap (bf16)
    xs_ref   : (1, Ho*Wo, Cip)      strided raw input rows for the shortcut (bf16)
    ws_ref   : (Cip, Cop)           shortcut 1x1 conv weights (bf16)
    o_ref    : (1, Ho*Wo, Cop)      final block output (f32, lane dense)
    """
    cp = apad_ref.shape[-1]
    # Shortcut matmul: tiny (K = Cin), hides entirely under the 9 tap matmuls.
    acc = jnp.dot(xs_ref[0], ws_ref[...], preferred_element_type=jnp.float32)

    a_full = apad_ref[0].astype(jnp.float32)       # (Ho+2, Wo+2, Cp)
    for kh in range(3):
        for kw in range(3):
            a = a_full[kh:kh + Ho, kw:kw + Wo, :]
            a = a.reshape(Ho * Wo, cp).astype(jnp.bfloat16)
            acc = acc + jnp.dot(a, w_ref[kh * 3 + kw],
                                preferred_element_type=jnp.float32)

    o_ref[...] = acc[None].astype(o_ref.dtype)


# ----------------------------- pallas_call wrappers -------------------------

_CPARAMS = pltpu.CompilerParams(
    dimension_semantics=("parallel",),          # images are independent (megacore on v7x)
    vmem_limit_bytes=32 * 1024 * 1024,
)


def _conv1_call(xph, w1, insc, insh, outsc, outsh, *, s, Ho, Wo, Cp, Cop):
    N, Hph, Wph, Cph = xph.shape
    kern = functools.partial(_conv1_kernel, s=s, Ho=Ho, Wo=Wo, Cp=Cp)
    return pl.pallas_call(
        kern,
        out_shape=jax.ShapeDtypeStruct((N, Ho * Wo, Cop), jnp.bfloat16),
        grid=(N,),
        in_specs=[
            pl.BlockSpec((1, Hph, Wph, Cph), lambda n: (n, 0, 0, 0)),
            pl.BlockSpec(w1.shape, lambda n: (0, 0, 0)),
            pl.BlockSpec(insc.shape, lambda n: (0, 0, 0)),
            pl.BlockSpec(insh.shape, lambda n: (0, 0, 0)),
            pl.BlockSpec(outsc.shape, lambda n: (0, 0)),
            pl.BlockSpec(outsh.shape, lambda n: (0, 0)),
        ],
        out_specs=pl.BlockSpec((1, Ho * Wo, Cop), lambda n: (n, 0, 0)),
        compiler_params=_CPARAMS,
    )(xph, w1, insc, insh, outsc, outsh)


def _conv2_call(a2p, w2, xs, ws, *, Ho, Wo, Cop):
    N = a2p.shape[0]
    kern = functools.partial(_conv2_kernel, Ho=Ho, Wo=Wo)
    return pl.pallas_call(
        kern,
        out_shape=jax.ShapeDtypeStruct((N, Ho * Wo, Cop), jnp.float32),
        grid=(N,),
        in_specs=[
            pl.BlockSpec((1,) + a2p.shape[1:], lambda n: (n, 0, 0, 0)),
            pl.BlockSpec(w2.shape, lambda n: (0, 0, 0)),
            pl.BlockSpec((1,) + xs.shape[1:], lambda n: (n, 0, 0)),
            pl.BlockSpec(ws.shape, lambda n: (0, 0)),
        ],
        out_specs=pl.BlockSpec((1, Ho * Wo, Cop), lambda n: (n, 0, 0)),
        compiler_params=_CPARAMS,
    )(a2p, w2, xs, ws)


# ----------------------------- parameter preparation ------------------------
# Called ONCE, outside the jitted forward (review item: don't re-fold BN / re-layout
# weights every call).

def _fold_bn(gamma, beta, mean, var, cp):
    scale = (gamma / jnp.sqrt(var + EPS)).astype(jnp.float32)
    shift = (beta - mean * scale).astype(jnp.float32)
    c = gamma.shape[0]
    return jnp.pad(scale, (0, cp - c)), jnp.pad(shift, (0, cp - c))


def _conv_w_to_taps(w, cin_p, cout_p):
    # torch (Cout, Cin, kh, kw) -> (kh*kw, Cin_p, Cout_p) bf16, zero-padded channels.
    cout, cin, kh, kw = w.shape
    wm = jnp.transpose(w, (2, 3, 1, 0)).reshape(kh * kw, cin, cout)
    wm = jnp.pad(wm, ((0, 0), (0, cin_p - cin), (0, cout_p - cout)))
    return wm.astype(jnp.bfloat16)


def prepare_block_params(params, s):
    cout, cin = params["w1"].shape[0], params["w1"].shape[1]
    cip = _round_up(cin, LANE)
    cop = _round_up(cout, LANE)

    sc1, sh1 = _fold_bn(params["bn1_g"], params["bn1_b"], params["bn1_m"], params["bn1_v"], cip)
    sc2, sh2 = _fold_bn(params["bn2_g"], params["bn2_b"], params["bn2_m"], params["bn2_v"], cop)

    # Per-channel sentinel pad value v with relu(v*scale1 + shift1) == 0, so that
    # BN1+ReLU1 can be fused into the conv kernel while the conv's zero padding
    # stays exact.  TODO(synk): gamma==0 with beta>0 has no such sentinel (pathological).
    safe = jnp.where(sc1 == 0.0, 1.0, sc1)
    sent = jnp.where(sc1 == 0.0, 0.0, -(jnp.abs(sh1) + 1.0) / safe)

    if "ws" in params:
        ws2d = params["ws"][:, :, 0, 0]                       # (Cout, Cin)
    else:  # identity shortcut (s==1 and Cin==Cout)
        ws2d = jnp.eye(cout, dtype=jnp.float32)
    ws_mat = jnp.pad(jnp.transpose(ws2d, (1, 0)),
                     ((0, cip - cin), (0, cop - cout))).astype(jnp.bfloat16)

    return dict(
        w1=_conv_w_to_taps(params["w1"], cip, cop),
        w2=_conv_w_to_taps(params["w2"], cop, cop),
        ws=ws_mat,                                            # (Cip, Cop)
        insc=jnp.tile(sc1, s * s).reshape(1, 1, s * s * cip),
        insh=jnp.tile(sh1, s * s).reshape(1, 1, s * s * cip),
        outsc=sc2.reshape(1, cop),
        outsh=sh2.reshape(1, cop),
        sent=sent,                                            # (Cip,)
    )


# ----------------------------- forward ---------------------------------------

def wide_resnet_block(x_nchw, pp, *, s, cout):
    """Forward of WideResNetBlock. x: (N, Cin, H, W) -> (N, Cout, Ho, Wo)."""
    k, p = 3, 1
    x = jnp.transpose(x_nchw, (0, 2, 3, 1)).astype(jnp.float32)   # NHWC
    N, H, W, Cin = x.shape
    Cip, Cop = pp["ws"].shape
    Ho = (H + 2 * p - k) // s + 1
    Wo = (W + 2 * p - k) // s + 1

    # ---- conv1 input prep: channel pad, sentinel halo, stride-phase decomposition.
    # Pure data reshuffling (~1x input bytes); all arithmetic runs in the kernels.
    x_cp = jnp.pad(x, ((0, 0), (0, 0), (0, 0), (0, Cip - Cin)))
    xp = jnp.broadcast_to(pp["sent"], (N, H + 2 * p, W + 2 * p, Cip))
    xp = xp.at[:, p:p + H, p:p + W, :].set(x_cp)
    Hph = Ho + (k - 1) // s
    Wph = Wo + (k - 1) // s
    phases = []
    for a in range(s):
        for b in range(s):
            ph = xp[:, a::s, b::s, :][:, :Hph, :Wph, :]
            ph = jnp.pad(ph, ((0, 0), (0, Hph - ph.shape[1]),
                              (0, Wph - ph.shape[2]), (0, 0)))
            phases.append(ph)
    xph = jnp.concatenate(phases, axis=-1).astype(jnp.bfloat16)   # (N,Hph,Wph,s*s*Cip)

    # ---- fused kernel 1: relu(bn2(conv3x3_s(relu(bn1(x)))))  -> a2 (bf16, Cout padded)
    a2 = _conv1_call(xph, pp["w1"], pp["insc"], pp["insh"], pp["outsc"], pp["outsh"],
                     s=s, Ho=Ho, Wo=Wo, Cp=Cip, Cop=Cop)

    # ---- conv2 input: zero spatial pad of the already-activated a2 (data movement only)
    a2p = jnp.pad(a2.reshape(N, Ho, Wo, Cop), ((0, 0), (1, 1), (1, 1), (0, 0)))

    # ---- shortcut input: strided raw x rows (1x1 conv, stride s, no padding)
    xs = x_cp[:, ::s, ::s, :][:, :Ho, :Wo, :].reshape(N, Ho * Wo, Cip).astype(jnp.bfloat16)

    # ---- fused kernel 2: conv3x3_s1(a2) + shortcut(x)  (f32 output)
    out = _conv2_call(a2p, pp["w2"], xs, pp["ws"], Ho=Ho, Wo=Wo, Cop=Cop)

    out = out.reshape(N, Ho, Wo, Cop)[:, :, :, :cout]
    return jnp.transpose(out, (0, 3, 1, 2))                      # back to NCHW
    # TODO(synk): for very large feature maps add a row-tile grid axis (overlapping
    #             halo rows) and a Cout-tile axis; per-image blocks already fit VMEM
    #             for standard WideResNet layer sizes.


# ----------------------------- pure-JAX f32 reference ------------------------

def reference_forward(x_nchw, params, s):
    x = jnp.transpose(x_nchw, (0, 2, 3, 1)).astype(jnp.float32)

    def bn_relu_ref(x, g, b, m, v):
        return jnp.maximum((x - m) / jnp.sqrt(v + EPS) * g + b, 0.0)

    def conv_ref(x, w, stride, pad):
        return jax.lax.conv_general_dilated(
            x, jnp.transpose(w, (2, 3, 1, 0)).astype(jnp.float32),
            window_strides=(stride, stride), padding=((pad, pad), (pad, pad)),
            dimension_numbers=("NHWC", "HWIO", "NHWC"))

    a1 = bn_relu_ref(x, params["bn1_g"], params["bn1_b"], params["bn1_m"], params["bn1_v"])
    c1 = conv_ref(a1, params["w1"], s, 1)
    a2 = bn_relu_ref(c1, params["bn2_g"], params["bn2_b"], params["bn2_m"], params["bn2_v"])
    c2 = conv_ref(a2, params["w2"], 1, 1)
    sc = conv_ref(x, params["ws"], s, 0)
    return jnp.transpose(c2 + sc, (0, 3, 1, 2))


# ----------------------------- main ------------------------------------------

def make_params(key, inp, outp):
    ks = jax.random.split(key, 12)
    return {
        "bn1_g": jax.random.uniform(ks[0], (inp,), jnp.float32, 0.5, 1.5),
        "bn1_b": 0.1 * jax.random.normal(ks[1], (inp,), jnp.float32),
        "bn1_m": 0.1 * jax.random.normal(ks[2], (inp,), jnp.float32),
        "bn1_v": jax.random.uniform(ks[3], (inp,), jnp.float32, 0.5, 1.5),
        "w1": 0.1 * jax.random.normal(ks[4], (outp, inp, 3, 3), jnp.float32),
        "bn2_g": jax.random.uniform(ks[5], (outp,), jnp.float32, 0.5, 1.5),
        "bn2_b": 0.1 * jax.random.normal(ks[6], (outp,), jnp.float32),
        "bn2_m": 0.1 * jax.random.normal(ks[7], (outp,), jnp.float32),
        "bn2_v": jax.random.uniform(ks[8], (outp,), jnp.float32, 0.5, 1.5),
        "w2": 0.1 * jax.random.normal(ks[9], (outp, outp, 3, 3), jnp.float32),
        "ws": 0.1 * jax.random.normal(ks[10], (outp, inp, 1, 1), jnp.float32),
    }


if __name__ == "__main__":
    N, Cin, Cout, H, W = 2, 4, 8, 16, 16
    stride = 2          # s != 1 -> shortcut is a 1x1 strided conv
    # dr = 0.3          # Dropout2d: identity in eval mode

    key = jax.random.PRNGKey(0)
    kx, kp = jax.random.split(key)
    x = jax.random.normal(kx, (N, Cin, H, W), jnp.float32)
    params = make_params(kp, Cin, Cout)

    pp = prepare_block_params(params, stride)          # once, outside jit
    fwd = jax.jit(functools.partial(wide_resnet_block, s=stride, cout=Cout))
    out = jax.block_until_ready(fwd(x, pp))

    ref = jax.block_until_ready(reference_forward(x, params, stride))
    assert out.shape == (N, Cout, 8, 8), out.shape
    max_err = float(jnp.max(jnp.abs(out - ref)))
    # bf16 matmul operands (f32 accumulation) -> compare against f32 reference with
    # a bf16-appropriate tolerance.
    assert jnp.allclose(out, ref, atol=5e-2, rtol=5e-2), max_err

    print("KERNEL_OK")
</pallas_src>

<mosaic_0001>
module attributes {stable_mosaic.version = 11 : i64} {
  func.func @_conv1_kernel(%arg0: i32, %arg1: memref<1x9x9x512xbf16, #tpu.memory_space<vmem>>, %arg2: memref<9x128x128xbf16, #tpu.memory_space<vmem>>, %arg3: memref<1x1x512xf32, #tpu.memory_space<vmem>>, %arg4: memref<1x1x512xf32, #tpu.memory_space<vmem>>, %arg5: memref<1x128xf32, #tpu.memory_space<vmem>>, %arg6: memref<1x128xf32, #tpu.memory_space<vmem>>, %arg7: memref<1x64x128xbf16, #tpu.memory_space<vmem>>) attributes {dimension_semantics = [#tpu.dimension_semantics<parallel>], iteration_bounds = array<i64: 2>, scalar_prefetch = 0 : i64, scratch_operands = 0 : i64, tpu.core_type = #tpu.core_type<tc>, window_params = [{transform_indices = @transform_0, window_bounds = array<i64: 1, 9, 9, 512>}, {pipeline_mode = #tpu.pipeline_mode<synchronous>, transform_indices = @transform_1, window_bounds = array<i64: 9, 128, 128>}, {pipeline_mode = #tpu.pipeline_mode<synchronous>, transform_indices = @transform_2, window_bounds = array<i64: 1, 1, 512>}, {pipeline_mode = #tpu.pipeline_mode<synchronous>, transform_indices = @transform_3, window_bounds = array<i64: 1, 1, 512>}, {pipeline_mode = #tpu.pipeline_mode<synchronous>, transform_indices = @transform_4, window_bounds = array<i64: 1, 128>}, {pipeline_mode = #tpu.pipeline_mode<synchronous>, transform_indices = @transform_5, window_bounds = array<i64: 1, 128>}, {transform_indices = @transform_6, window_bounds = array<i64: 1, 64, 128>}]} {
    %c0 = arith.constant 0 : index
    %c0_0 = arith.constant 0 : index
    %c0_1 = arith.constant 0 : index
    %c0_2 = arith.constant 0 : index
    %0 = vector.load %arg1[%c0, %c0_0, %c0_1, %c0_2] : memref<1x9x9x512xbf16, #tpu.memory_space<vmem>>, vector<1x9x9x512xbf16>
    %1 = vector.shape_cast %0 : vector<1x9x9x512xbf16> to vector<9x9x512xbf16>
    %2 = arith.extf %1 : vector<9x9x512xbf16> to vector<9x9x512xf32>
    %c0_3 = arith.constant 0 : index
    %c0_4 = arith.constant 0 : index
    %c0_5 = arith.constant 0 : index
    %3 = vector.load %arg3[%c0_3, %c0_4, %c0_5] : memref<1x1x512xf32, #tpu.memory_space<vmem>>, vector<1x1x512xf32>
    %4 = vector.broadcast %3 : vector<1x1x512xf32> to vector<9x9x512xf32>
    %5 = arith.mulf %2, %4 : vector<9x9x512xf32>
    %c0_6 = arith.constant 0 : index
    %c0_7 = arith.constant 0 : index
    %c0_8 = arith.constant 0 : index
    %6 = vector.load %arg4[%c0_6, %c0_7, %c0_8] : memref<1x1x512xf32, #tpu.memory_space<vmem>>, vector<1x1x512xf32>
    %7 = vector.broadcast %6 : vector<1x1x512xf32> to vector<9x9x512xf32>
    %8 = arith.addf %5, %7 : vector<9x9x512xf32>
    %cst = arith.constant 0.000000e+00 : f32
    %9 = vector.broadcast %cst : f32 to vector<9x9x512xf32>
    %10 = arith.maximumf %8, %9 : vector<9x9x512xf32>
    %cst_9 = arith.constant 0.000000e+00 : f32
    %11 = vector.broadcast %cst_9 : f32 to vector<64x128xf32>
    %12 = vector.extract_strided_slice %10 {offsets = [0, 0, 0], sizes = [8, 8, 128], strides = [1, 1, 1]} : vector<9x9x512xf32> to vector<8x8x128xf32>
    %13 = vector.shape_cast %12 : vector<8x8x128xf32> to vector<64x128xf32>
    %14 = arith.truncf %13 : vector<64x128xf32> to vector<64x128xbf16>
    %c0_10 = arith.constant 0 : index
    %c0_11 = arith.constant 0 : index
    %c0_12 = arith.constant 0 : index
    %15 = vector.load %arg2[%c0_10, %c0_11, %c0_12] : memref<9x128x128xbf16, #tpu.memory_space<vmem>>, vector<1x128x128xbf16>
    %16 = vector.shape_cast %15 : vector<1x128x128xbf16> to vector<128x128xbf16>
    %cst_13 = arith.constant dense<0.000000e+00> : vector<64x128xf32>
    %17 = tpu.matmul %14, %16, %cst_13 {dimension_numbers = #tpu.dot_dimension_numbers<[1], [0], [0], [1], [0, 0, 1, 1], [], []>} : vector<64x128xbf16>, vector<128x128xbf16>, vector<64x128xf32> -> vector<64x128xf32>
    %18 = arith.addf %11, %17 : vector<64x128xf32>
    %19 = vector.extract_strided_slice %10 {offsets = [0, 0, 128], sizes = [8, 8, 128], strides = [1, 1, 1]} : vector<9x9x512xf32> to vector<8x8x128xf32>
    %20 = vector.shape_cast %19 : vector<8x8x128xf32> to vector<64x128xf32>
    %21 = arith.truncf %20 : vector<64x128xf32> to vector<64x128xbf16>
    %c1 = arith.constant 1 : index
    %c0_14 = arith.constant 0 : index
    %c0_15 = arith.constant 0 : index
    %22 = vector.load %arg2[%c1, %c0_14, %c0_15] : memref<9x128x128xbf16, #tpu.memory_space<vmem>>, vector<1x128x128xbf16>
    %23 = vector.shape_cast %22 : vector<1x128x128xbf16> to vector<128x128xbf16>
    %cst_16 = arith.constant dense<0.000000e+00> : vector<64x128xf32>
    %24 = tpu.matmul %21, %23, %cst_16 {dimension_numbers = #tpu.dot_dimension_numbers<[1], [0], [0], [1], [0, 0, 1, 1], [], []>} : vector<64x128xbf16>, vector<128x128xbf16>, vector<64x128xf32> -> vector<64x128xf32>
    %25 = arith.addf %18, %24 : vector<64x128xf32>
    %26 = vector.extract_strided_slice %10 {offsets = [0, 1, 0], sizes = [8, 8, 128], strides = [1, 1, 1]} : vector<9x9x512xf32> to vector<8x8x128xf32>
    %27 = vector.shape_cast %26 : vector<8x8x128xf32> to vector<64x128xf32>
    %28 = arith.truncf %27 : vector<64x128xf32> to vector<64x128xbf16>
    %c2 = arith.constant 2 : index
    %c0_17 = arith.constant 0 : index
    %c0_18 = arith.constant 0 : index
    %29 = vector.load %arg2[%c2, %c0_17, %c0_18] : memref<9x128x128xbf16, #tpu.memory_space<vmem>>, vector<1x128x128xbf16>
    %30 = vector.shape_cast %29 : vector<1x128x128xbf16> to vector<128x128xbf16>
    %cst_19 = arith.constant dense<0.000000e+00> : vector<64x128xf32>
    %31 = tpu.matmul %28, %30, %cst_19 {dimension_numbers = #tpu.dot_dimension_numbers<[1], [0], [0], [1], [0, 0, 1, 1], [], []>} : vector<64x128xbf16>, vector<128x128xbf16>, vector<64x128xf32> -> vector<64x128xf32>
    %32 = arith.addf %25, %31 : vector<64x128xf32>
    %33 = vector.extract_strided_slice %10 {offsets = [0, 0, 256], sizes = [8, 8, 128], strides = [1, 1, 1]} : vector<9x9x512xf32> to vector<8x8x128xf32>
    %34 = vector.shape_cast %33 : vector<8x8x128xf32> to vector<64x128xf32>
    %35 = arith.truncf %34 : vector<64x128xf32> to vector<64x128xbf16>
    %c3 = arith.constant 3 : index
    %c0_20 = arith.constant 0 : index
    %c0_21 = arith.constant 0 : index
    %36 = vector.load %arg2[%c3, %c0_20, %c0_21] : memref<9x128x128xbf16, #tpu.memory_space<vmem>>, vector<1x128x128xbf16>
    %37 = vector.shape_cast %36 : vector<1x128x128xbf16> to vector<128x128xbf16>
    %cst_22 = arith.constant dense<0.000000e+00> : vector<64x128xf32>
    %38 = tpu.matmul %35, %37, %cst_22 {dimension_numbers = #tpu.dot_dimension_numbers<[1], [0], [0], [1], [0, 0, 1, 1], [], []>} : vector<64x128xbf16>, vector<128x128xbf16>, vector<64x128xf32> -> vector<64x128xf32>
    %39 = arith.addf %32, %38 : vector<64x128xf32>
    %40 = vector.extract_strided_slice %10 {offsets = [0, 0, 384], sizes = [8, 8, 128], strides = [1, 1, 1]} : vector<9x9x512xf32> to vector<8x8x128xf32>
    %41 = vector.shape_cast %40 : vector<8x8x128xf32> to vector<64x128xf32>
    %42 = arith.truncf %41 : vector<64x128xf32> to vector<64x128xbf16>
    %c4 = arith.constant 4 : index
    %c0_23 = arith.constant 0 : index
    %c0_24 = arith.constant 0 : index
    %43 = vector.load %arg2[%c4, %c0_23, %c0_24] : memref<9x128x128xbf16, #tpu.memory_space<vmem>>, vector<1x128x128xbf16>
    %44 = vector.shape_cast %43 : vector<1x128x128xbf16> to vector<128x128xbf16>
    %cst_25 = arith.constant dense<0.000000e+00> : vector<64x128xf32>
    %45 = tpu.matmul %42, %44, %cst_25 {dimension_numbers = #tpu.dot_dimension_numbers<[1], [0], [0], [1], [0, 0, 1, 1], [], []>} : vector<64x128xbf16>, vector<128x128xbf16>, vector<64x128xf32> -> vector<64x128xf32>
    %46 = arith.addf %39, %45 : vector<64x128xf32>
    %47 = vector.extract_strided_slice %10 {offsets = [0, 1, 256], sizes = [8, 8, 128], strides = [1, 1, 1]} : vector<9x9x512xf32> to vector<8x8x128xf32>
    %48 = vector.shape_cast %47 : vector<8x8x128xf32> to vector<64x128xf32>
    %49 = arith.truncf %48 : vector<64x128xf32> to vector<64x128xbf16>
    %c5 = arith.constant 5 : index
    %c0_26 = arith.constant 0 : index
    %c0_27 = arith.constant 0 : index
    %50 = vector.load %arg2[%c5, %c0_26, %c0_27] : memref<9x128x128xbf16, #tpu.memory_space<vmem>>, vector<1x128x128xbf16>
    %51 = vector.shape_cast %50 : vector<1x128x128xbf16> to vector<128x128xbf16>
    %cst_28 = arith.constant dense<0.000000e+00> : vector<64x128xf32>
    %52 = tpu.matmul %49, %51, %cst_28 {dimension_numbers = #tpu.dot_dimension_numbers<[1], [0], [0], [1], [0, 0, 1, 1], [], []>} : vector<64x128xbf16>, vector<128x128xbf16>, vector<64x128xf32> -> vector<64x128xf32>
    %53 = arith.addf %46, %52 : vector<64x128xf32>
    %54 = vector.extract_strided_slice %10 {offsets = [1, 0, 0], sizes = [8, 8, 128], strides = [1, 1, 1]} : vector<9x9x512xf32> to vector<8x8x128xf32>
    %55 = vector.shape_cast %54 : vector<8x8x128xf32> to vector<64x128xf32>
    %56 = arith.truncf %55 : vector<64x128xf32> to vector<64x128xbf16>
    %c6 = arith.constant 6 : index
    %c0_29 = arith.constant 0 : index
    %c0_30 = arith.constant 0 : index
    %57 = vector.load %arg2[%c6, %c0_29, %c0_30] : memref<9x128x128xbf16, #tpu.memory_space<vmem>>, vector<1x128x128xbf16>
    %58 = vector.shape_cast %57 : vector<1x128x128xbf16> to vector<128x128xbf16>
    %cst_31 = arith.constant dense<0.000000e+00> : vector<64x128xf32>
    %59 = tpu.matmul %56, %58, %cst_31 {dimension_numbers = #tpu.dot_dimension_numbers<[1], [0], [0], [1], [0, 0, 1, 1], [], []>} : vector<64x128xbf16>, vector<128x128xbf16>, vector<64x128xf32> -> vector<64x128xf32>
    %60 = arith.addf %53, %59 : vector<64x128xf32>
    %61 = vector.extract_strided_slice %10 {offsets = [1, 0, 128], sizes = [8, 8, 128], strides = [1, 1, 1]} : vector<9x9x512xf32> to vector<8x8x128xf32>
    %62 = vector.shape_cast %61 : vector<8x8x128xf32> to vector<64x128xf32>
    %63 = arith.truncf %62 : vector<64x128xf32> to vector<64x128xbf16>
    %c7 = arith.constant 7 : index
    %c0_32 = arith.constant 0 : index
    %c0_33 = arith.constant 0 : index
    %64 = vector.load %arg2[%c7, %c0_32, %c0_33] : memref<9x128x128xbf16, #tpu.memory_space<vmem>>, vector<1x128x128xbf16>
    %65 = vector.shape_cast %64 : vector<1x128x128xbf16> to vector<128x128xbf16>
    %cst_34 = arith.constant dense<0.000000e+00> : vector<64x128xf32>
    %66 = tpu.matmul %63, %65, %cst_34 {dimension_numbers = #tpu.dot_dimension_numbers<[1], [0], [0], [1], [0, 0, 1, 1], [], []>} : vector<64x128xbf16>, vector<128x128xbf16>, vector<64x128xf32> -> vector<64x128xf32>
    %67 = arith.addf %60, %66 : vector<64x128xf32>
    %68 = vector.extract_strided_slice %10 {offsets = [1, 1, 0], sizes = [8, 8, 128], strides = [1, 1, 1]} : vector<9x9x512xf32> to vector<8x8x128xf32>
    %69 = vector.shape_cast %68 : vector<8x8x128xf32> to vector<64x128xf32>
    %70 = arith.truncf %69 : vector<64x128xf32> to vector<64x128xbf16>
    %c8 = arith.constant 8 : index
    %c0_35 = arith.constant 0 : index
    %c0_36 = arith.constant 0 : index
    %71 = vector.load %arg2[%c8, %c0_35, %c0_36] : memref<9x128x128xbf16, #tpu.memory_space<vmem>>, vector<1x128x128xbf16>
    %72 = vector.shape_cast %71 : vector<1x128x128xbf16> to vector<128x128xbf16>
    %cst_37 = arith.constant dense<0.000000e+00> : vector<64x128xf32>
    %73 = tpu.matmul %70, %72, %cst_37 {dimension_numbers = #tpu.dot_dimension_numbers<[1], [0], [0], [1], [0, 0, 1, 1], [], []>} : vector<64x128xbf16>, vector<128x128xbf16>, vector<64x128xf32> -> vector<64x128xf32>
    %74 = arith.addf %67, %73 : vector<64x128xf32>
    %c0_38 = arith.constant 0 : index
    %c0_39 = arith.constant 0 : index
    %75 = vector.load %arg5[%c0_38, %c0_39] : memref<1x128xf32, #tpu.memory_space<vmem>>, vector<1x128xf32>
    %76 = vector.broadcast %75 : vector<1x128xf32> to vector<64x128xf32>
    %77 = arith.mulf %74, %76 : vector<64x128xf32>
    %c0_40 = arith.constant 0 : index
    %c0_41 = arith.constant 0 : index
    %78 = vector.load %arg6[%c0_40, %c0_41] : memref<1x128xf32, #tpu.memory_space<vmem>>, vector<1x128xf32>
    %79 = vector.broadcast %78 : vector<1x128xf32> to vector<64x128xf32>
    %80 = arith.addf %77, %79 : vector<64x128xf32>
    %cst_42 = arith.constant 0.000000e+00 : f32
    %81 = vector.broadcast %cst_42 : f32 to vector<64x128xf32>
    %82 = arith.maximumf %80, %81 : vector<64x128xf32>
    %83 = vector.shape_cast %82 : vector<64x128xf32> to vector<1x64x128xf32>
    %84 = arith.truncf %83 : vector<1x64x128xf32> to vector<1x64x128xbf16>
    %c0_43 = arith.constant 0 : index
    %c0_44 = arith.constant 0 : index
    %c0_45 = arith.constant 0 : index
    %85 = vector.load %arg7[%c0_43, %c0_44, %c0_45] : memref<1x64x128xbf16, #tpu.memory_space<vmem>>, vector<1x64x128xbf16>
    tpu.vector_store %arg7[%c0_43, %c0_44, %c0_45], %84 {strides = array<i32>} : memref<1x64x128xbf16, #tpu.memory_space<vmem>>, vector<1x64x128xbf16>,
    return
  }
  func.func @transform_0(%arg0: i32) -> (i32, i32, i32, i32) {
    %c0_i32 = arith.constant 0 : i32
    %c0_i32_0 = arith.constant 0 : i32
    %c0_i32_1 = arith.constant 0 : i32
    %c0_i32_2 = arith.constant 0 : i32
    return %arg0, %c0_i32, %c0_i32_0, %c0_i32_1 : i32, i32, i32, i32
  }
  func.func @transform_1(%arg0: i32) -> (i32, i32, i32) {
    %c0_i32 = arith.constant 0 : i32
    %c0_i32_0 = arith.constant 0 : i32
    %c0_i32_1 = arith.constant 0 : i32
    %c0_i32_2 = arith.constant 0 : i32
    return %c0_i32, %c0_i32_0, %c0_i32_1 : i32, i32, i32
  }
  func.func @transform_2(%arg0: i32) -> (i32, i32, i32) {
    %c0_i32 = arith.constant 0 : i32
    %c0_i32_0 = arith.constant 0 : i32
    %c0_i32_1 = arith.constant 0 : i32
    %c0_i32_2 = arith.constant 0 : i32
    return %c0_i32, %c0_i32_0, %c0_i32_1 : i32, i32, i32
  }
  func.func @transform_3(%arg0: i32) -> (i32, i32, i32) {
    %c0_i32 = arith.constant 0 : i32
    %c0_i32_0 = arith.constant 0 : i32
    %c0_i32_1 = arith.constant 0 : i32
    %c0_i32_2 = arith.constant 0 : i32
    return %c0_i32, %c0_i32_0, %c0_i32_1 : i32, i32, i32
  }
  func.func @transform_4(%arg0: i32) -> (i32, i32) {
    %c0_i32 = arith.constant 0 : i32
    %c0_i32_0 = arith.constant 0 : i32
    %c0_i32_1 = arith.constant 0 : i32
    return %c0_i32, %c0_i32_0 : i32, i32
  }
  func.func @transform_5(%arg0: i32) -> (i32, i32) {
    %c0_i32 = arith.constant 0 : i32
    %c0_i32_0 = arith.constant 0 : i32
    %c0_i32_1 = arith.constant 0 : i32
    return %c0_i32, %c0_i32_0 : i32, i32
  }
  func.func @transform_6(%arg0: i32) -> (i32, i32, i32) {
    %c0_i32 = arith.constant 0 : i32
    %c0_i32_0 = arith.constant 0 : i32
    %c0_i32_1 = arith.constant 0 : i32
    return %arg0, %c0_i32, %c0_i32_0 : i32, i32, i32
  }
}

module attributes {stable_mosaic.version = 11 : i64} {
  func.func @_conv2_kernel(%arg0: i32, %arg1: memref<1x10x10x128xbf16, #tpu.memory_space<vmem>>, %arg2: memref<9x128x128xbf16, #tpu.memory_space<vmem>>, %arg3: memref<1x64x128xbf16, #tpu.memory_space<vmem>>, %arg4: memref<128x128xbf16, #tpu.memory_space<vmem>>, %arg5: memref<1x64x128xf32, #tpu.memory_space<vmem>>) attributes {dimension_semantics = [#tpu.dimension_semantics<parallel>], iteration_bounds = array<i64: 2>, scalar_prefetch = 0 : i64, scratch_operands = 0 : i64, tpu.core_type = #tpu.core_type<tc>, window_params = [{transform_indices = @transform_0, window_bounds = array<i64: 1, 10, 10, 128>}, {pipeline_mode = #tpu.pipeline_mode<synchronous>, transform_indices = @transform_1, window_bounds = array<i64: 9, 128, 128>}, {transform_indices = @transform_2, window_bounds = array<i64: 1, 64, 128>}, {pipeline_mode = #tpu.pipeline_mode<synchronous>, transform_indices = @transform_3, window_bounds = array<i64: 128, 128>}, {transform_indices = @transform_4, window_bounds = array<i64: 1, 64, 128>}]} {
    %c0 = arith.constant 0 : index
    %c0_0 = arith.constant 0 : index
    %c0_1 = arith.constant 0 : index
    %0 = vector.load %arg3[%c0, %c0_0, %c0_1] : memref<1x64x128xbf16, #tpu.memory_space<vmem>>, vector<1x64x128xbf16>
    %1 = vector.shape_cast %0 : vector<1x64x128xbf16> to vector<64x128xbf16>
    %c0_2 = arith.constant 0 : index
    %c0_3 = arith.constant 0 : index
    %2 = vector.load %arg4[%c0_2, %c0_3] : memref<128x128xbf16, #tpu.memory_space<vmem>>, vector<128x128xbf16>
    %cst = arith.constant dense<0.000000e+00> : vector<64x128xf32>
    %3 = tpu.matmul %1, %2, %cst {dimension_numbers = #tpu.dot_dimension_numbers<[1], [0], [0], [1], [0, 0, 1, 1], [], []>} : vector<64x128xbf16>, vector<128x128xbf16>, vector<64x128xf32> -> vector<64x128xf32>
    %c0_4 = arith.constant 0 : index
    %c0_5 = arith.constant 0 : index
    %c0_6 = arith.constant 0 : index
    %c0_7 = arith.constant 0 : index
    %4 = vector.load %arg1[%c0_4, %c0_5, %c0_6, %c0_7] : memref<1x10x10x128xbf16, #tpu.memory_space<vmem>>, vector<1x10x10x128xbf16>
    %5 = vector.shape_cast %4 : vector<1x10x10x128xbf16> to vector<10x10x128xbf16>
    %6 = arith.extf %5 : vector<10x10x128xbf16> to vector<10x10x128xf32>
    %7 = vector.extract_strided_slice %6 {offsets = [0, 0, 0], sizes = [8, 8, 128], strides = [1, 1, 1]} : vector<10x10x128xf32> to vector<8x8x128xf32>
    %8 = vector.shape_cast %7 : vector<8x8x128xf32> to vector<64x128xf32>
    %9 = arith.truncf %8 : vector<64x128xf32> to vector<64x128xbf16>
    %c0_8 = arith.constant 0 : index
    %c0_9 = arith.constant 0 : index
    %c0_10 = arith.constant 0 : index
    %10 = vector.load %arg2[%c0_8, %c0_9, %c0_10] : memref<9x128x128xbf16, #tpu.memory_space<vmem>>, vector<1x128x128xbf16>
    %11 = vector.shape_cast %10 : vector<1x128x128xbf16> to vector<128x128xbf16>
    %cst_11 = arith.constant dense<0.000000e+00> : vector<64x128xf32>
    %12 = tpu.matmul %9, %11, %cst_11 {dimension_numbers = #tpu.dot_dimension_numbers<[1], [0], [0], [1], [0, 0, 1, 1], [], []>} : vector<64x128xbf16>, vector<128x128xbf16>, vector<64x128xf32> -> vector<64x128xf32>
    %13 = arith.addf %3, %12 : vector<64x128xf32>
    %14 = vector.extract_strided_slice %6 {offsets = [0, 1, 0], sizes = [8, 8, 128], strides = [1, 1, 1]} : vector<10x10x128xf32> to vector<8x8x128xf32>
    %15 = vector.shape_cast %14 : vector<8x8x128xf32> to vector<64x128xf32>
    %16 = arith.truncf %15 : vector<64x128xf32> to vector<64x128xbf16>
    %c1 = arith.constant 1 : index
    %c0_12 = arith.constant 0 : index
    %c0_13 = arith.constant 0 : index
    %17 = vector.load %arg2[%c1, %c0_12, %c0_13] : memref<9x128x128xbf16, #tpu.memory_space<vmem>>, vector<1x128x128xbf16>
    %18 = vector.shape_cast %17 : vector<1x128x128xbf16> to vector<128x128xbf16>
    %cst_14 = arith.constant dense<0.000000e+00> : vector<64x128xf32>
    %19 = tpu.matmul %16, %18, %cst_14 {dimension_numbers = #tpu.dot_dimension_numbers<[1], [0], [0], [1], [0, 0, 1, 1], [], []>} : vector<64x128xbf16>, vector<128x128xbf16>, vector<64x128xf32> -> vector<64x128xf32>
    %20 = arith.addf %13, %19 : vector<64x128xf32>
    %21 = vector.extract_strided_slice %6 {offsets = [0, 2, 0], sizes = [8, 8, 128], strides = [1, 1, 1]} : vector<10x10x128xf32> to vector<8x8x128xf32>
    %22 = vector.shape_cast %21 : vector<8x8x128xf32> to vector<64x128xf32>
    %23 = arith.truncf %22 : vector<64x128xf32> to vector<64x128xbf16>
    %c2 = arith.constant 2 : index
    %c0_15 = arith.constant 0 : index
    %c0_16 = arith.constant 0 : index
    %24 = vector.load %arg2[%c2, %c0_15, %c0_16] : memref<9x128x128xbf16, #tpu.memory_space<vmem>>, vector<1x128x128xbf16>
    %25 = vector.shape_cast %24 : vector<1x128x128xbf16> to vector<128x128xbf16>
    %cst_17 = arith.constant dense<0.000000e+00> : vector<64x128xf32>
    %26 = tpu.matmul %23, %25, %cst_17 {dimension_numbers = #tpu.dot_dimension_numbers<[1], [0], [0], [1], [0, 0, 1, 1], [], []>} : vector<64x128xbf16>, vector<128x128xbf16>, vector<64x128xf32> -> vector<64x128xf32>
    %27 = arith.addf %20, %26 : vector<64x128xf32>
    %28 = vector.extract_strided_slice %6 {offsets = [1, 0, 0], sizes = [8, 8, 128], strides = [1, 1, 1]} : vector<10x10x128xf32> to vector<8x8x128xf32>
    %29 = vector.shape_cast %28 : vector<8x8x128xf32> to vector<64x128xf32>
    %30 = arith.truncf %29 : vector<64x128xf32> to vector<64x128xbf16>
    %c3 = arith.constant 3 : index
    %c0_18 = arith.constant 0 : index
    %c0_19 = arith.constant 0 : index
    %31 = vector.load %arg2[%c3, %c0_18, %c0_19] : memref<9x128x128xbf16, #tpu.memory_space<vmem>>, vector<1x128x128xbf16>
    %32 = vector.shape_cast %31 : vector<1x128x128xbf16> to vector<128x128xbf16>
    %cst_20 = arith.constant dense<0.000000e+00> : vector<64x128xf32>
    %33 = tpu.matmul %30, %32, %cst_20 {dimension_numbers = #tpu.dot_dimension_numbers<[1], [0], [0], [1], [0, 0, 1, 1], [], []>} : vector<64x128xbf16>, vector<128x128xbf16>, vector<64x128xf32> -> vector<64x128xf32>
    %34 = arith.addf %27, %33 : vector<64x128xf32>
    %35 = vector.extract_strided_slice %6 {offsets = [1, 1, 0], sizes = [8, 8, 128], strides = [1, 1, 1]} : vector<10x10x128xf32> to vector<8x8x128xf32>
    %36 = vector.shape_cast %35 : vector<8x8x128xf32> to vector<64x128xf32>
    %37 = arith.truncf %36 : vector<64x128xf32> to vector<64x128xbf16>
    %c4 = arith.constant 4 : index
    %c0_21 = arith.constant 0 : index
    %c0_22 = arith.constant 0 : index
    %38 = vector.load %arg2[%c4, %c0_21, %c0_22] : memref<9x128x128xbf16, #tpu.memory_space<vmem>>, vector<1x128x128xbf16>
    %39 = vector.shape_cast %38 : vector<1x128x128xbf16> to vector<128x128xbf16>
    %cst_23 = arith.constant dense<0.000000e+00> : vector<64x128xf32>
    %40 = tpu.matmul %37, %39, %cst_23 {dimension_numbers = #tpu.dot_dimension_numbers<[1], [0], [0], [1], [0, 0, 1, 1], [], []>} : vector<64x128xbf16>, vector<128x128xbf16>, vector<64x128xf32> -> vector<64x128xf32>
    %41 = arith.addf %34, %40 : vector<64x128xf32>
    %42 = vector.extract_strided_slice %6 {offsets = [1, 2, 0], sizes = [8, 8, 128], strides = [1, 1, 1]} : vector<10x10x128xf32> to vector<8x8x128xf32>
    %43 = vector.shape_cast %42 : vector<8x8x128xf32> to vector<64x128xf32>
    %44 = arith.truncf %43 : vector<64x128xf32> to vector<64x128xbf16>
    %c5 = arith.constant 5 : index
    %c0_24 = arith.constant 0 : index
    %c0_25 = arith.constant 0 : index
    %45 = vector.load %arg2[%c5, %c0_24, %c0_25] : memref<9x128x128xbf16, #tpu.memory_space<vmem>>, vector<1x128x128xbf16>
    %46 = vector.shape_cast %45 : vector<1x128x128xbf16> to vector<128x128xbf16>
    %cst_26 = arith.constant dense<0.000000e+00> : vector<64x128xf32>
    %47 = tpu.matmul %44, %46, %cst_26 {dimension_numbers = #tpu.dot_dimension_numbers<[1], [0], [0], [1], [0, 0, 1, 1], [], []>} : vector<64x128xbf16>, vector<128x128xbf16>, vector<64x128xf32> -> vector<64x128xf32>
    %48 = arith.addf %41, %47 : vector<64x128xf32>
    %49 = vector.extract_strided_slice %6 {offsets = [2, 0, 0], sizes = [8, 8, 128], strides = [1, 1, 1]} : vector<10x10x128xf32> to vector<8x8x128xf32>
    %50 = vector.shape_cast %49 : vector<8x8x128xf32> to vector<64x128xf32>
    %51 = arith.truncf %50 : vector<64x128xf32> to vector<64x128xbf16>
    %c6 = arith.constant 6 : index
    %c0_27 = arith.constant 0 : index
    %c0_28 = arith.constant 0 : index
    %52 = vector.load %arg2[%c6, %c0_27, %c0_28] : memref<9x128x128xbf16, #tpu.memory_space<vmem>>, vector<1x128x128xbf16>
    %53 = vector.shape_cast %52 : vector<1x128x128xbf16> to vector<128x128xbf16>
    %cst_29 = arith.constant dense<0.000000e+00> : vector<64x128xf32>
    %54 = tpu.matmul %51, %53, %cst_29 {dimension_numbers = #tpu.dot_dimension_numbers<[1], [0], [0], [1], [0, 0, 1, 1], [], []>} : vector<64x128xbf16>, vector<128x128xbf16>, vector<64x128xf32> -> vector<64x128xf32>
    %55 = arith.addf %48, %54 : vector<64x128xf32>
    %56 = vector.extract_strided_slice %6 {offsets = [2, 1, 0], sizes = [8, 8, 128], strides = [1, 1, 1]} : vector<10x10x128xf32> to vector<8x8x128xf32>
    %57 = vector.shape_cast %56 : vector<8x8x128xf32> to vector<64x128xf32>
    %58 = arith.truncf %57 : vector<64x128xf32> to vector<64x128xbf16>
    %c7 = arith.constant 7 : index
    %c0_30 = arith.constant 0 : index
    %c0_31 = arith.constant 0 : index
    %59 = vector.load %arg2[%c7, %c0_30, %c0_31] : memref<9x128x128xbf16, #tpu.memory_space<vmem>>, vector<1x128x128xbf16>
    %60 = vector.shape_cast %59 : vector<1x128x128xbf16> to vector<128x128xbf16>
    %cst_32 = arith.constant dense<0.000000e+00> : vector<64x128xf32>
    %61 = tpu.matmul %58, %60, %cst_32 {dimension_numbers = #tpu.dot_dimension_numbers<[1], [0], [0], [1], [0, 0, 1, 1], [], []>} : vector<64x128xbf16>, vector<128x128xbf16>, vector<64x128xf32> -> vector<64x128xf32>
    %62 = arith.addf %55, %61 : vector<64x128xf32>
    %63 = vector.extract_strided_slice %6 {offsets = [2, 2, 0], sizes = [8, 8, 128], strides = [1, 1, 1]} : vector<10x10x128xf32> to vector<8x8x128xf32>
    %64 = vector.shape_cast %63 : vector<8x8x128xf32> to vector<64x128xf32>
    %65 = arith.truncf %64 : vector<64x128xf32> to vector<64x128xbf16>
    %c8 = arith.constant 8 : index
    %c0_33 = arith.constant 0 : index
    %c0_34 = arith.constant 0 : index
    %66 = vector.load %arg2[%c8, %c0_33, %c0_34] : memref<9x128x128xbf16, #tpu.memory_space<vmem>>, vector<1x128x128xbf16>
    %67 = vector.shape_cast %66 : vector<1x128x128xbf16> to vector<128x128xbf16>
    %cst_35 = arith.constant dense<0.000000e+00> : vector<64x128xf32>
    %68 = tpu.matmul %65, %67, %cst_35 {dimension_numbers = #tpu.dot_dimension_numbers<[1], [0], [0], [1], [0, 0, 1, 1], [], []>} : vector<64x128xbf16>, vector<128x128xbf16>, vector<64x128xf32> -> vector<64x128xf32>
    %69 = arith.addf %62, %68 : vector<64x128xf32>
    %70 = vector.shape_cast %69 : vector<64x128xf32> to vector<1x64x128xf32>
    %c0_36 = arith.constant 0 : index
    %c0_37 = arith.constant 0 : index
    %c0_38 = arith.constant 0 : index
    %71 = vector.load %arg5[%c0_36, %c0_37, %c0_38] : memref<1x64x128xf32, #tpu.memory_space<vmem>>, vector<1x64x128xf32>
    tpu.vector_store %arg5[%c0_36, %c0_37, %c0_38], %70 {strides = array<i32>} : memref<1x64x128xf32, #tpu.memory_space<vmem>>, vector<1x64x128xf32>,
    return
  }
  func.func @transform_0(%arg0: i32) -> (i32, i32, i32, i32) {
    %c0_i32 = arith.constant 0 : i32
    %c0_i32_0 = arith.constant 0 : i32
    %c0_i32_1 = arith.constant 0 : i32
    %c0_i32_2 = arith.constant 0 : i32
    return %arg0, %c0_i32, %c0_i32_0, %c0_i32_1 : i32, i32, i32, i32
  }
  func.func @transform_1(%arg0: i32) -> (i32, i32, i32) {
    %c0_i32 = arith.constant 0 : i32
    %c0_i32_0 = arith.constant 0 : i32
    %c0_i32_1 = arith.constant 0 : i32
    %c0_i32_2 = arith.constant 0 : i32
    return %c0_i32, %c0_i32_0, %c0_i32_1 : i32, i32, i32
  }
  func.func @transform_2(%arg0: i32) -> (i32, i32, i32) {
    %c0_i32 = arith.constant 0 : i32
    %c0_i32_0 = arith.constant 0 : i32
    %c0_i32_1 = arith.constant 0 : i32
    return %arg0, %c0_i32, %c0_i32_0 : i32, i32, i32
  }
  func.func @transform_3(%arg0: i32) -> (i32, i32) {
    %c0_i32 = arith.constant 0 : i32
    %c0_i32_0 = arith.constant 0 : i32
    %c0_i32_1 = arith.constant 0 : i32
    return %c0_i32, %c0_i32_0 : i32, i32
  }
  func.func @transform_4(%arg0: i32) -> (i32, i32, i32) {
    %c0_i32 = arith.constant 0 : i32
    %c0_i32_0 = arith.constant 0 : i32
    %c0_i32_1 = arith.constant 0 : i32
    return %arg0, %c0_i32, %c0_i32_0 : i32, i32, i32
  }
}

</mosaic_0001>

<bundles_post_ra>
// kernel: wide_resnet_block.3
= control target key start
LH: loop header
LB: loop body
LE: loop exit
PB: predicated region body
PF: predicated region fallthrough
CT: control target
= control target key end

     0   :  { %s2659_s15 = smov 0   ;;  %s3219_s0 = inlined_call_operand.vmem [shape: bf16[2,10,10,128], index: 0, kind: input, shape index: {}]   ;;  %s3220_s1 = inlined_call_operand.vmem [shape: bf16[9,128,128], index: 1, kind: input, shape index: {}]   ;;  %s3221_s2 = inlined_call_operand.vmem [shape: bf16[2,64,128], index: 2, kind: input, shape index: {}]   ;;  %s3222_s3 = inlined_call_operand.vmem [shape: bf16[128,128], index: 3, kind: input, shape index: {}]   ;;  %s3223_s4 = inlined_call_operand.vmem [shape: f32[2,64,128], index: 4, kind: output, shape index: {}]  }
   0x1 LB: > { %s1857_s16 = sadd.s32 4294967295, %s2632_s15   ;;  %p1861_p0 = scmp.ge.s32.totalorder %s2632_s15, 1  ;;  %s2632_s15 = sphi %s2659_s15, %s14_s15  }
   0x2   : > { %p172_p1 = scmp.lt.s32.totalorder %s2632_s15, 3 }
   0x4   : > { %p173_p2 = pnand %p1861_p0, %p172_p1 }
   0x5   : > { %v2533_v0 = vld [vmem:[%s3220_s1] sm:$0xff] (!%p173_p2)   ;;  %p203_p3 = scmp.lt.s32.totalorder (!%p173_p2), %s1857_s16, 1  ;;  %v2535_v2 = vld [vmem:[%s3220_s1 + $0x8] sm:$0xff] (!%p173_p2)   ;;  %v2537_v4 = vld [vmem:[%s3220_s1 + $0x10] sm:$0xff] (!%p173_p2)   ;;  %vm569_vm0 = vcmask (!%p173_p2), 1046528   ;;  %vm744_vm1 = vcmask (!%p173_p2), 1045504  }
   0x6   : > { %176 = sbr.rel (%p173_p2) target bundleno = 393 (0x189), region = 36  ;;  %v2534_v1 = vld [vmem:[%s3220_s1 + $0x100] sm:$0xff] (!%p173_p2)   ;;  %2212 = vmatprep.subr.bf16.mxu1 (!%p173_p2), %v2533_v0  ;;  %v2536_v3 = vld [vmem:[%s3220_s1 + $0x108] sm:$0xff] (!%p173_p2)   ;;  %v2538_v5 = vld [vmem:[%s3220_s1 + $0x110] sm:$0xff] (!%p173_p2)  }
   0x7   : > { %2332 = vmatprep.subr.bf16.mxu0 (!%p173_p2), %v2534_v1  ;;  %2213 = vmatpush3.bf16.msra.mxu1 (!%p173_p2), %v2533_v0  ;;  %v2539_v6 = vld [vmem:[%s3220_s1 + $0x18] sm:$0xff] (!%p173_p2)   ;;  %v2541_v8 = vld [vmem:[%s3220_s1 + $0x20] sm:$0xff] (!%p173_p2)   ;;  %v2543_v10 = vld [vmem:[%s3220_s1 + $0x28] sm:$0xff] (!%p173_p2)  }
   0x8   : > { %2333 = vmatpush3.bf16.msra.mxu0 (!%p173_p2), %v2534_v1  ;;  %2214 = vmatprep.subr.bf16.mxu1 (!%p173_p2), %v2535_v2  ;;  %v2540_v7 = vld [vmem:[%s3220_s1 + $0x118] sm:$0xff] (!%p173_p2)   ;;  %v2542_v9 = vld [vmem:[%s3220_s1 + $0x120] sm:$0xff] (!%p173_p2)   ;;  %v2544_v13 = vld [vmem:[%s3220_s1 + $0x128] sm:$0xff] (!%p173_p2)  }
   0x9   : > { %2334 = vmatprep.subr.bf16.mxu0 (!%p173_p2), %v2536_v3  ;;  %v2545_v19 = vld [vmem:[%s3220_s1 + $0x30] sm:$0xff] (!%p173_p2)   ;;  %v2547_v31 = vld [vmem:[%s3220_s1 + $0x38] sm:$0xff] (!%p173_p2)   ;;  %v2550_v45 = vld [vmem:[%s3222_s3] sm:$0xff] (!%p173_p2)  }
   0xa   : > { %v2546_v22 = vld [vmem:[%s3220_s1 + $0x130] sm:$0xff] (!%p173_p2)   ;;  %v2548_v36 = vld [vmem:[%s3220_s1 + $0x138] sm:$0xff] (!%p173_p2)   ;;  %v2551_v48 = vld [vmem:[%s3220_s1 + $0x140] sm:$0xff] (!%p173_p2)  }
   0xb   : > { %2215 = vmatpush3.bf16.msra.mxu1 (!%p173_p2), %v2535_v2  ;;  %v2553_v52 = vld [vmem:[%s3222_s3 + $0x8] sm:$0xff] (!%p173_p2)   ;;  %v2555_v1 = vld [vmem:[%s3222_s3 + $0x10] sm:$0xff] (!%p173_p2)  }
   0xc   : > { %2335 = vmatpush3.bf16.msra.mxu0 (!%p173_p2), %v2536_v3  ;;  %2216 = vmatprep.subr.bf16.mxu1 (!%p173_p2), %v2537_v4  ;;  %v2554_v53 = vld [vmem:[%s3220_s1 + $0x148] sm:$0xff] (!%p173_p2)  }
   0xd   : > { %s3225_s16 = smov (!%p203_p3, %s1857_s16), 1  ;;  %2336 = vmatprep.subr.bf16.mxu0 %v2538_v5 }
   0xe   : > { %s2524_s7 = smul.u32 80, %s3225_s16  ;;  %s2091_s22 = sshll.u32 %s3225_s16, 6 }
   0xf   : > { %2217 = vmatpush3.bf16.msra.mxu1 %v2537_v4  ;;  %s3206_s25 = scalar_lea.vmem %s3223_s4, %s2091_s22 }
  0x10   : > { %2337 = vmatpush3.bf16.msra.mxu0 %v2538_v5  ;;  %2218 = vmatprep.subr.bf16.mxu1 %v2539_v6  ;;  %s2703_s14 = scalar_lea.vmem %s3219_s0, %s2524_s7  ;;  %s2090_s7 = sshll.u32 %s3225_s16, 5 }
  0x11   : > { %2338 = vmatprep.subr.bf16.mxu0 %v2540_v7  ;;  %v2709_v11 = vld [vmem:[%s2703_s14] sm:$0xf]  ;;  %v2712_v12 = vld [vmem:[%s2703_s14 + $0x8] sm:$0xf]  ;;  %v246_v16 = vld [vmem:[%s2703_s14 + $0xc] sm:$0x1]  ;;  %s2861_s21 = scalar_lea.vmem %s3221_s2, %s2090_s7 }
  0x12   : > { %v265_v14 = vunpack.c.l.bf16 %v2712_v12  ;;  %v1867_v15 = vcombine.low %v2709_v11, %v2712_v12  ;;  %v2722_v17 = vld [vmem:[%s2703_s14 + $0x10] sm:$0xf]  ;;  %v2725_v18 = vld [vmem:[%s2703_s14 + $0x14] sm:$0x1]  ;;  %v2731_v20 = vld [vmem:[%s2703_s14 + $0x18] sm:$0xf]  ;;  %v266_v21 = vunpack.c.l.bf16 %v246_v16 }
  0x13   : > { %2219 = vmatpush3.bf16.msra.mxu1 %v2539_v6  ;;  %v2737_v23 = vld [vmem:[%s2703_s14 + $0x1c] sm:$0x1]  ;;  %v267_v24 = vunpack.c.l.bf16 %v2722_v17  ;;  %v268_v25 = vunpack.c.l.bf16 %v2725_v18  ;;  %v269_v26 = vunpack.c.l.bf16 %v2731_v20  ;;  %v2744_v30 = vld [vmem:[%s2703_s14 + $0x20] sm:$0xf]  ;;  %v2752_v35 = vld [vmem:[%s2703_s14 + $0x24] sm:$0x1]  ;;  %v2787_v49 = vcombine.low %v2722_v17, %v2731_v20 }
  0x14   : > { %2339 = vmatpush3.bf16.msra.mxu0 %v2540_v7  ;;  %2220 = vmatprep.subr.bf16.mxu1 %v2541_v8  ;;  %v270_v27 = vunpack.c.l.bf16 %v2737_v23  ;;  %v573_v28 = vrot.slane %v265_v14, 1  ;;  %v574_v29 = vrot.slane %v266_v21, 1  ;;  %v271_v39 = vunpack.c.l.bf16 %v2744_v30  ;;  %v2799_v54 = vld [vmem:[%s2703_s14 + $0x28] sm:$0xf]  ;;  %v2812_v62 = vld [vmem:[%s2703_s14 + $0x2c] sm:$0x1] }
  0x15   : > { %2340 = vmatprep.subr.bf16.mxu0 %v2542_v9  ;;  %2228 = vmatprep.mubr.bf16.mxu1 %v1867_v15  ;;  %v576_v32 = vrot.slane %v267_v24, 1  ;;  %v577_v33 = vrot.slane %v268_v25, 1  ;;  %v579_v34 = vrot.slane %v269_v26, 1  ;;  %v272_v40 = vunpack.c.l.bf16 %v2752_v35  ;;  %v2815_v63 = vld [vmem:[%s2703_s14 + $0x30] sm:$0xf]  ;;  %v2568_v23 = vld [vmem:[%s3220_s1 + $0x178] sm:$0xff]  }
  0x16   : > { %v2758_v37 = vsel %vm569_vm0, %v573_v28, %v574_v29  ;;  %v580_v38 = vrot.slane %v270_v27, 1  ;;  %v582_v43 = vrot.slane %v271_v39, 1  ;;  %v748_v50 = vrot.slane %v265_v14, 2  ;;  %v2818_v0 = vld [vmem:[%s2703_s14 + $0x34] sm:$0x1]  ;;  %v2557_v28 = vld [vmem:[%s3222_s3 + $0x18] sm:$0xff]  }
  0x17   : > { %2221 = vmatpush3.bf16.msra.mxu1 %v2541_v8  ;;  %v2765_v41 = vsel %vm569_vm0, %v576_v32, %v577_v33  ;;  %v583_v44 = vrot.slane %v272_v40, 1  ;;  %v749_v55 = vrot.slane %v266_v21, 2  ;;  %v1939_v56 = vcombine.low %v2712_v12, %v2722_v17  ;;  %v2829_v6 = vld [vmem:[%s2703_s14 + $0x38] sm:$0xf]  ;;  %v2832_v7 = vld [vmem:[%s2703_s14 + $0x3c] sm:$0x1] }
  0x18   : > { %2341 = vmatpush3.bf16.msra.mxu0 %v2542_v9  ;;  %2222 = vmatprep.subr.bf16.mxu1 %v2543_v10  ;;  %v1067_v42 = vpack.c.bf16 %v2765_v41, %v2758_v37  ;;  %v2777_v46 = vsel %vm569_vm0, %v579_v34, %v580_v38  ;;  %v1940_v57 = vcombine.low %v2731_v20, %v2744_v30  ;;  %v273_v58 = vunpack.c.l.bf16 %v2799_v54  ;;  %v2835_v8 = vld [vmem:[%s2703_s14 + $0x40] sm:$0xf]  ;;  %v2618_v12 = vld [vmem:[%s3220_s1 + $0xf0] sm:$0xff]  }
  0x19   : > { %2342 = vmatprep.subr.bf16.mxu0 %v2544_v13  ;;  %v2780_v47 = vsel %vm569_vm0, %v582_v43, %v583_v44  ;;  %v2808_v59 = vcombine.low %v2744_v30, %v2799_v54  ;;  %v751_v60 = vrot.slane %v267_v24, 2  ;;  %v752_v61 = vrot.slane %v268_v25, 2  ;;  %v2569_v43 = vld [vmem:[%s2861_s21] sm:$0xff]   ;;  %v2558_v44 = vld [vmem:[%s3220_s1 + $0x158] sm:$0xff]   ;;  %v2619_v17 = vld [vmem:[%s3220_s1 + $0x230] sm:$0xff]  }
  0x1a   : > { %2348 = vmatprep.mubr.bf16.mxu0 %v1067_v42  ;;  %v1068_v51 = vpack.c.bf16 %v2780_v47, %v2777_v46  ;;  %v274_v2 = vunpack.c.l.bf16 %v2812_v62  ;;  %v275_v3 = vunpack.c.l.bf16 %v2815_v63  ;;  %v276_v4 = vunpack.c.l.bf16 %v2818_v0  ;;  %v2572_v62 = vld [vmem:[%s2861_s21 + $0x8] sm:$0xff]  }
  0x1b   : > { %2223 = vmatpush3.bf16.msra.mxu1 %v2543_v10  ;;  %v585_v5 = vrot.slane %v273_v58, 1  ;;  %v2838_v9 = vsel %vm744_vm1, %v748_v50, %v749_v55  ;;  %v1941_v10 = vcombine.low %v2799_v54, %v2815_v63  ;;  %v277_v18 = vunpack.c.l.bf16 %v2829_v6  ;;  %v2560_v55 = vld [vmem:[%s3220_s1 + $0x160] sm:$0xff]   ;;  %v2573_v0 = vld [vmem:[%s3220_s1 + $0x48] sm:$0xff]  }
  0x1c   : > { %2343 = vmatpush3.bf16.msra.mxu0 %v2544_v13  ;;  %2224 = vmatprep.subr.bf16.mxu1 %v2545_v19  ;;  %v2556_v13 = vld [vmem:[%s3220_s1 + $0x150] sm:$0xff]   ;;  %v586_v14 = vrot.slane %v274_v2, 1  ;;  %v588_v15 = vrot.slane %v275_v3, 1  ;;  %v589_v16 = vrot.slane %v276_v4, 1  ;;  %v2865_v21 = vcombine.low %v2815_v63, %v2829_v6 }
  0x1d   : > { %2344 = vmatprep.subr.bf16.mxu0 %v2546_v22  ;;  %v279_v24 = vunpack.c.l.bf16 %v2835_v8  ;;  %v591_v32 = vrot.slane %v277_v18, 1  ;;  %v2882_v33 = vsel %vm744_vm1, %v751_v60, %v752_v61  ;;  %v2561_v60 = vld [vmem:[%s3222_s3 + $0x28] sm:$0xff]   ;;  %v761_v35 = vrot.slane %v274_v2, 2 }
  0x1e   : > { %v2874_v29 = vsel %vm569_vm0, %v585_v5, %v586_v14  ;;  %v2562_v61 = vld [vmem:[%s3220_s1 + $0x168] sm:$0xff]   ;;  %v2565_v5 = vld [vmem:[%s3220_s1 + $0x170] sm:$0xff]   ;;  %v755_v14 = vrot.slane %v270_v27, 2  ;;  %v760_v27 = vrot.slane %v273_v58, 2  ;;  %v2571_v58 = vld [vmem:[%s3220_s1 + $0x180] sm:$0xff]   ;;  %v263_v2 = vunpack.c.l.bf16 %v2709_v11 }
  0x1f   : > { %2225 = vmatpush3.bf16.msra.mxu1 %v2545_v19  ;;  %v2854_v19 = vld [vmem:[%s2703_s14 + $0x44] sm:$0x1]  ;;  %v1063_v38 = vrot.slane %v279_v24, 1  ;;  %v2594_v11 = vld [vmem:[%s3220_s1 + $0x1d0] sm:$0xff]  }
  0x20   : > { %2345 = vmatpush3.bf16.msra.mxu0 %v2546_v22  ;;  %2226 = vmatprep.subr.bf16.mxu1 %v2547_v31  ;;  %v278_v22 = vunpack.c.l.bf16 %v2832_v7  ;;  %v280_v25 = vunpack.c.l.bf16 %v2854_v19  ;;  %v2575_v19 = vld [vmem:[%s3220_s1 + $0x50] sm:$0xff]  }
  0x21   : > { %2346 = vmatprep.subr.bf16.mxu0 %v2548_v36 }
  0x22   : > { %v1064_v42 = vrot.slane %v280_v25, 1 }
  0x23   : > { %2227 = vmatpush3.bf16.msra.mxu1 %v2547_v31  ;;  %v2877_v31 = vsel %vm569_vm0, %v588_v15, %v589_v16  ;;  %v757_v15 = vrot.slane %v271_v39, 2  ;;  %v758_v16 = vrot.slane %v272_v40, 2 }
  0x24   : > { %2347 = vmatpush3.bf16.msra.mxu0 %v2548_v36  ;;  %2236 = vmatprep.subr.bf16.mxu1 %v2550_v45  ;;  %v1069_v34 = vpack.c.bf16 %v2877_v31, %v2874_v29  ;;  %v592_v36 = vrot.slane %v278_v22, 1  ;;  %v2903_v50 = vsel %vm569_vm0, %v1063_v38, %v1064_v42 }
  0x25   : > { %2356 = vmatprep.subr.bf16.mxu0 %v2551_v48  ;;  %v2955_v40 = vsel %vm744_vm1, %v757_v15, %v758_v16  ;;  %v2578_v15 = vld [vmem:[%s3220_s1 + $0x198] sm:$0xff]   ;;  %v2579_v16 = vld [vmem:[%s3220_s1 + $0x60] sm:$0xff]  }
  0x26   : > { %2229 = vmatmul.mubr.bf16.vlgmr.msra.gmra.mrb[0].mxu1 %v2787_v49 }
  0x27   : > { %2237 = vmatpush3.bf16.msra.mxu1 %v2550_v45  ;;  %2349 = vmatmul.mubr.bf16.vlgmr.msra.gmra.mrb[0].mxu0 %v1068_v51  ;;  %v1942_v45 = vcombine.low %v2829_v6, %v2835_v8  ;;  %v1213_v51 = vpack.c.bf16 %v2882_v33, %v2838_v9 }
  0x28   : > { %2357 = vmatpush3.bf16.msra.mxu0 %v2551_v48  ;;  %2238 = vmatprep.subr.bf16.mxu1 %v2553_v52  ;;  %v2900_v48 = vsel %vm569_vm0, %v591_v32, %v592_v36  ;;  %v2939_v32 = vld [vmem:[%s2703_s14 + $0x4] sm:$0x1]  ;;  %v764_v36 = vrot.slane %v276_v4, 2  ;;  %v2976_v4 = vsel %vm744_vm1, %v760_v27, %v761_v35  ;;  %v2587_v27 = vld [vmem:[%s3220_s1 + $0x78] sm:$0xff]  }
  0x29   : > { %2358 = vmatprep.subr.bf16.mxu0 %v2554_v53  ;;  %2232 = vmatprep.mubr.bf16.mxu1 %v2808_v59  ;;  %v264_v38 = vunpack.c.l.bf16 %v2939_v32  ;;  %v2588_v35 = vld [vmem:[%s3220_s1 + $0x1b8] sm:$0xff]  }
  0x2a   : > { %2352 = vmatprep.mubr.bf16.mxu0 %v1069_v34  ;;  %v763_v34 = vrot.slane %v275_v3, 2  ;;  %v2574_v3 = vld [vmem:[%s3220_s1 + $0x188] sm:$0xff]   ;;  %v2595_v32 = vld [vmem:[%s3220_s1 + $0x98] sm:$0xff]  }
  0x2b   : > { %2239 = vmatpush3.bf16.msra.mxu1 %v2553_v52  ;;  %v1070_v52 = vpack.c.bf16 %v2903_v50, %v2900_v48 }
  0x2c   : > { %2359 = vmatpush3.bf16.msra.mxu0 %v2554_v53  ;;  %2240 = vmatprep.subr.bf16.mxu1 %v2555_v1  ;;  %v2559_v53 = vld [vmem:[%s3222_s3 + $0x20] sm:$0xff]  }
  0x2d   : > { %2360 = vmatprep.subr.bf16.mxu0 %v2556_v13 }
  0x2e   : > { %2233 = vmatmul.mubr.bf16.gmra.mrb[4].mxu1 %v2865_v21 }
  0x2f   : > { %2241 = vmatpush3.bf16.msra.mxu1 %v2555_v1  ;;  %2252 = vmatprep.mubr.bf16.mxu1 %v2569_v43  ;;  %v2564_v1 = vld [vmem:[%s3222_s3 + $0x30] sm:$0xff]   ;;  %v2979_v43 = vsel %vm744_vm1, %v763_v34, %v764_v36  ;;  %v2589_v34 = vld [vmem:[%s3220_s1 + $0x80] sm:$0xff]  }
  0x30   : > { %2361 = vmatpush3.bf16.msra.mxu0 %v2556_v13  ;;  %2242 = vmatprep.subr.bf16.mxu1 %v2557_v28  ;;  %v754_v13 = vrot.slane %v269_v26, 2  ;;  %v2570_v26 = vld [vmem:[%s3220_s1 + $0x40] sm:$0xff]   ;;  %v1215_v7 = vpack.c.bf16 %v2979_v43, %v2976_v4 }
  0x31   : > { %2362 = vmatprep.subr.bf16.mxu0 %v2558_v44  ;;  %2353 = vmatmul.mubr.bf16.gmra.mrb[4].mxu0 %v1070_v52  ;;  %v1209_v52 = vrot.slane %v279_v24, 2  ;;  %v2590_v36 = vld [vmem:[%s3220_s1 + $0x1c0] sm:$0xff]  }
  0x32   : > { %2372 = vmatprep.mubr.bf16.mxu0 %v1213_v51  ;;  %v2952_v39 = vsel %vm744_vm1, %v754_v13, %v755_v14  ;;  %v767_v51 = vrot.slane %v278_v22, 2  ;;  %v2577_v13 = vld [vmem:[%s3220_s1 + $0x58] sm:$0xff]  }
  0x33   : > { %2243 = vmatpush3.bf16.msra.mxu1 %v2557_v28  ;;  %v2567_v28 = vld [vmem:[%s3222_s3 + $0x38] sm:$0xff]   ;;  %v1214_v42 = vpack.c.bf16 %v2955_v40, %v2952_v39 }
  0x34   : > { %2363 = vmatpush3.bf16.msra.mxu0 %v2558_v44  ;;  %2244 = vmatprep.subr.bf16.mxu1 %v2559_v53  ;;  %v766_v44 = vrot.slane %v277_v18, 2  ;;  %v571_v18 = vrot.slane %v264_v38, 1 }
  0x35   : > { %2364 = vmatprep.subr.bf16.mxu0 %v2560_v55 }
  0x36   : > { %v3000_v22 = vsel %vm744_vm1, %v766_v44, %v767_v51  ;;  %v3071_v44 = vld [vmem:[%s2703_s14 + $0x48] sm:$0xf]  ;;  %v2601_v51 = vld [vmem:[%s3220_s1 + $0xb0] sm:$0xff]  }
  0x37   : > { %2245 = vmatpush3.bf16.msra.mxu1 %v2559_v53  ;;  %v1210_v53 = vrot.slane %v280_v25, 2  ;;  %v2576_v25 = vld [vmem:[%s3220_s1 + $0x190] sm:$0xff]  }
  0x38   : > { %2365 = vmatpush3.bf16.msra.mxu0 %v2560_v55  ;;  %2246 = vmatprep.subr.bf16.mxu1 %v2561_v60  ;;  %v2583_v55 = vld [vmem:[%s2861_s21 + $0x10] sm:$0xff]  }
  0x39   : > { %2366 = vmatprep.subr.bf16.mxu0 %v2562_v61  ;;  %v3003_v24 = vsel %vm744_vm1, %v1209_v52, %v1210_v53  ;;  %v2602_v52 = vld [vmem:[%s3220_s1 + $0x1f0] sm:$0xff]   ;;  %v2604_v53 = vld [vmem:[%s3220_s1 + $0xb8] sm:$0xff]  }
  0x3b   : > { %2247 = vmatpush3.bf16.msra.mxu1 %v2561_v60  ;;  %v570_v60 = vrot.slane %v263_v2, 1 }
  0x3c   : > { %2367 = vmatpush3.bf16.msra.mxu0 %v2562_v61  ;;  %2248 = vmatprep.subr.bf16.mxu1 %v2564_v1 }
  0x3d   : > { %2368 = vmatprep.subr.bf16.mxu0 %v2565_v5  ;;  %v572_v61 = vsel %vm569_vm0, %v570_v60, %v571_v18  ;;  %v3118_v60 = vld [vmem:[%s2703_s14 + $0x4c] sm:$0x1]  ;;  %v281_v18 = vunpack.c.l.bf16 %v3071_v44 }
  0x3e   : > { %v602_v14 = vpack.c.bf16 %v2758_v37, %v572_v61  ;;  %v2581_v37 = vld [vmem:[%s3220_s1 + $0x68] sm:$0xff]   ;;  %v778_v61 = vpack.c.bf16 %v2952_v39, %v2882_v33  ;;  %v779_v33 = vpack.c.bf16 %v2976_v4, %v2955_v40  ;;  %v2610_v39 = vld [vmem:[%s3220_s1 + $0xd0] sm:$0xff]   ;;  %v780_v40 = vpack.c.bf16 %v3000_v22, %v2979_v43  ;;  %v2615_v43 = vld [vmem:[%s3220_s1 + $0x220] sm:$0xff]  }
  0x3f   : > { %2249 = vmatpush3.bf16.msra.mxu1 %v2564_v1  ;;  %v2586_v1 = vld [vmem:[%s2861_s21 + $0x18] sm:$0xff]  }
  0x40   : > { %2369 = vmatpush3.bf16.msra.mxu0 %v2565_v5  ;;  %2250 = vmatprep.subr.bf16.mxu1 %v2567_v28  ;;  %v1216_v5 = vpack.c.bf16 %v3003_v24, %v3000_v22  ;;  %v2616_v22 = vld [vmem:[%s3220_s1 + $0xe8] sm:$0xff]  }
  0x41   : > { %2370 = vmatprep.subr.bf16.mxu0 %v2568_v23 }
  0x43   : > { %2251 = vmatpush3.bf16.msra.mxu1 %v2567_v28  ;;  %v2580_v28 = vld [vmem:[%s3220_s1 + $0x1a0] sm:$0xff]  }
  0x44   : > { %2371 = vmatpush3.bf16.msra.mxu0 %v2568_v23  ;;  %2260 = vmatprep.subr.bf16.mxu1 %v2570_v26  ;;  %v2582_v23 = vld [vmem:[%s3220_s1 + $0x1a8] sm:$0xff]  }
  0x45   : > { %2380 = vmatprep.subr.bf16.mxu0 %v2571_v58 }
  0x46   : > { %2253 = vmatmul.mubr.bf16.vlgmr.msra.gmra.mrb[0].mxu1 %v2572_v62  ;;  %v2591_v62 = vld [vmem:[%s3220_s1 + $0x88] sm:$0xff]  }
  0x47   : > { %2261 = vmatpush3.bf16.msra.mxu1 %v2570_v26  ;;  %2373 = vmatmul.mubr.bf16.vlgmr.msra.gmra.mrb[0].mxu0 %v1214_v42  ;;  %v2584_v26 = vld [vmem:[%s3220_s1 + $0x70] sm:$0xff]   ;;  %v2592_v42 = vld [vmem:[%s3220_s1 + $0x1c8] sm:$0xff]  }
  0x48   : > { %2381 = vmatpush3.bf16.msra.mxu0 %v2571_v58  ;;  %2262 = vmatprep.subr.bf16.mxu1 %v2573_v0  ;;  %v603_v58 = vpack.c.bf16 %v2777_v46, %v2765_v41  ;;  %v745_v41 = vrot.slane %v263_v2, 2  ;;  %v746_v46 = vrot.slane %v264_v38, 2  ;;  %v2598_v2 = vld [vmem:[%s3220_s1 + $0x1e0] sm:$0xff]   ;;  %v2600_v38 = vld [vmem:[%s3220_s1 + $0x1e8] sm:$0xff]  }
  0x49   : > { %2382 = vmatprep.subr.bf16.mxu0 %v2574_v3  ;;  %2256 = vmatprep.mubr.bf16.mxu1 %v2583_v55  ;;  %v2605_v55 = vld [vmem:[%s3220_s1 + $0x1f8] sm:$0xff]  }
  0x4a   : > { %2376 = vmatprep.mubr.bf16.mxu0 %v1215_v7  ;;  %v2606_v7 = vld [vmem:[%s3220_s1 + $0xc0] sm:$0xff]  }
  0x4b   : > { %2263 = vmatpush3.bf16.msra.mxu1 %v2573_v0  ;;  %v3060_v0 = vpack.c.bf16 %v2874_v29, %v2780_v47  ;;  %v3080_v47 = vpack.c.bf16 %v2900_v48, %v2877_v31  ;;  %v2015_v29 = vcombine.low %v2835_v8, %v3071_v44  ;;  %v2597_v48 = vld [vmem:[%s3220_s1 + $0xa0] sm:$0xff]  }
  0x4c   : > { %2383 = vmatpush3.bf16.msra.mxu0 %v2574_v3  ;;  %2264 = vmatprep.subr.bf16.mxu1 %v2575_v19  ;;  %v2593_v3 = vld [vmem:[%s3220_s1 + $0x90] sm:$0xff]  }
  0x4d   : > { %2384 = vmatprep.subr.bf16.mxu0 %v2576_v25 }
  0x4e   : > { %2257 = vmatmul.mubr.bf16.gmra.mrb[4].mxu1 %v2586_v1  ;;  %v1496_v1 = vrot.slane %v281_v18, 1 }
  0x4f   : > { %2265 = vmatpush3.bf16.msra.mxu1 %v2575_v19  ;;  %2377 = vmatmul.mubr.bf16.gmra.mrb[4].mxu0 %v1216_v5  ;;  %v282_v19 = vunpack.c.l.bf16 %v3118_v60  ;;  %v2608_v5 = vld [vmem:[%s3220_s1 + $0xc8] sm:$0xff]  }
  0x50   : > { %2385 = vmatpush3.bf16.msra.mxu0 %v2576_v25  ;;  %2266 = vmatprep.subr.bf16.mxu1 %v2577_v13  ;;  %v2607_v25 = vld [vmem:[%s3220_s1 + $0x200] sm:$0xff]  }
  0x51   : > { %2386 = vmatprep.subr.bf16.mxu0 %v2578_v15  ;;  %2276 = vmatprep.mubr.bf16.mxu1 %v602_v14  ;;  %v2609_v14 = vld [vmem:[%s3220_s1 + $0x208] sm:$0xff]  }
  0x52   : > { %2396 = vmatprep.mubr.bf16.mxu0 %v2787_v49  ;;  %v2585_v49 = vld [vmem:[%s3220_s1 + $0x1b0] sm:$0xff]  }
  0x53   : > { %2267 = vmatpush3.bf16.msra.mxu1 %v2577_v13  ;;  %v1497_v13 = vrot.slane %v282_v19, 1 }
  0x54   : > { %2387 = vmatpush3.bf16.msra.mxu0 %v2578_v15  ;;  %2268 = vmatprep.subr.bf16.mxu1 %v2579_v16 }
  0x55   : > { %2388 = vmatprep.subr.bf16.mxu0 %v2580_v28  ;;  %v1498_v15 = vsel %vm569_vm0, %v1496_v1, %v1497_v13 }
  0x56   : > { %v1500_v4 = vpack.c.bf16 %v1498_v15, %v2903_v50  ;;  %v2614_v50 = vld [vmem:[%s3220_s1 + $0xe0] sm:$0xff]  }
  0x57   : > { %2269 = vmatpush3.bf16.msra.mxu1 %v2579_v16  ;;  %v2611_v16 = vld [vmem:[%s3220_s1 + $0x210] sm:$0xff]  }
  0x58   : > { %2389 = vmatpush3.bf16.msra.mxu0 %v2580_v28  ;;  %2270 = vmatprep.subr.bf16.mxu1 %v2581_v37  ;;  %v2612_v28 = vld [vmem:[%s3220_s1 + $0xd8] sm:$0xff]  }
  0x59   : > { %2390 = vmatprep.subr.bf16.mxu0 %v2582_v23 }
  0x5b   : > { %2271 = vmatpush3.bf16.msra.mxu1 %v2581_v37  ;;  %v2613_v37 = vld [vmem:[%s3220_s1 + $0x218] sm:$0xff]  }
  0x5c   : > { %2391 = vmatpush3.bf16.msra.mxu0 %v2582_v23  ;;  %2272 = vmatprep.subr.bf16.mxu1 %v2584_v26  ;;  %v2617_v23 = vld [vmem:[%s3220_s1 + $0x228] sm:$0xff]  }
  0x5d   : > { %2392 = vmatprep.subr.bf16.mxu0 %v2585_v49 }
  0x5f   : > { %2273 = vmatpush3.bf16.msra.mxu1 %v2584_v26  ;;  %v2621_v26 = vld [vmem:[%s3220_s1 + $0x238] sm:$0xff]  }
  0x60   : > { %2393 = vmatpush3.bf16.msra.mxu0 %v2585_v49  ;;  %2274 = vmatprep.subr.bf16.mxu1 %v2587_v27  ;;  %v1639_v49 = vrot.slane %v281_v18, 2 }
  0x61   : > { %2394 = vmatprep.subr.bf16.mxu0 %v2588_v35 }
  0x63   : > { %2275 = vmatpush3.bf16.msra.mxu1 %v2587_v27  ;;  %v1640_v27 = vrot.slane %v282_v19, 2 }
  0x64   : > { %2395 = vmatpush3.bf16.msra.mxu0 %v2588_v35  ;;  %2284 = vmatprep.subr.bf16.mxu1 %v2589_v34 }
  0x65   : > { %2404 = vmatprep.subr.bf16.mxu0 %v2590_v36  ;;  %v1641_v35 = vsel %vm744_vm1, %v1639_v49, %v1640_v27 }
  0x66   : > { %2277 = vmatmul.mubr.bf16.vlgmr.msra.gmra.mrb[0].mxu1 %v603_v58 }
  0x67   : > { %2285 = vmatpush3.bf16.msra.mxu1 %v2589_v34  ;;  %2397 = vmatmul.mubr.bf16.vlgmr.msra.gmra.mrb[0].mxu0 %v2808_v59  ;;  %v747_v59 = vsel %vm744_vm1, %v745_v41, %v746_v46  ;;  %v1643_v34 = vpack.c.bf16 %v1641_v35, %v3003_v24 }
  0x68   : > { %2405 = vmatpush3.bf16.msra.mxu0 %v2590_v36  ;;  %2286 = vmatprep.subr.bf16.mxu1 %v2591_v62  ;;  %v777_v31 = vpack.c.bf16 %v2838_v9, %v747_v59  ;;  %v2599_v9 = vld [vmem:[%s3220_s1 + $0xa8] sm:$0xff]  }
  0x69   : > { %2406 = vmatprep.subr.bf16.mxu0 %v2592_v42  ;;  %2280 = vmatprep.mubr.bf16.mxu1 %v3060_v0 }
  0x6a   : > { %2400 = vmatprep.mubr.bf16.mxu0 %v2865_v21  ;;  %v2596_v21 = vld [vmem:[%s3220_s1 + $0x1d8] sm:$0xff]  }
  0x6b   : > { %2287 = vmatpush3.bf16.msra.mxu1 %v2591_v62 }
  0x6c   : > { %2407 = vmatpush3.bf16.msra.mxu0 %v2592_v42  ;;  %2288 = vmatprep.subr.bf16.mxu1 %v2593_v3 }
  0x6d   : > { %2408 = vmatprep.subr.bf16.mxu0 %v2594_v11 }
  0x6e   : > { %2281 = vmatmul.mubr.bf16.gmra.mrb[4].mxu1 %v3080_v47 }
  0x6f   : > { %2289 = vmatpush3.bf16.msra.mxu1 %v2593_v3  ;;  %2401 = vmatmul.mubr.bf16.gmra.mrb[4].mxu0 %v2015_v29 }
  0x70   : > { %2409 = vmatpush3.bf16.msra.mxu0 %v2594_v11  ;;  %2290 = vmatprep.subr.bf16.mxu1 %v2595_v32 }
  0x71   : > { %2410 = vmatprep.subr.bf16.mxu0 %v2596_v21  ;;  %2300 = vmatprep.mubr.bf16.mxu1 %v777_v31 }
  0x72   : > { %2420 = vmatprep.mubr.bf16.mxu0 %v603_v58 }
  0x73   : > { %2291 = vmatpush3.bf16.msra.mxu1 %v2595_v32 }
  0x74   : > { %2411 = vmatpush3.bf16.msra.mxu0 %v2596_v21  ;;  %2292 = vmatprep.subr.bf16.mxu1 %v2597_v48 }
  0x75   : > { %2412 = vmatprep.subr.bf16.mxu0 %v2598_v2 }
  0x77   : > { %2293 = vmatpush3.bf16.msra.mxu1 %v2597_v48 }
  0x78   : > { %2413 = vmatpush3.bf16.msra.mxu0 %v2598_v2  ;;  %2294 = vmatprep.subr.bf16.mxu1 %v2599_v9 }
  0x79   : > { %2414 = vmatprep.subr.bf16.mxu0 %v2600_v38 }
  0x7b   : > { %2295 = vmatpush3.bf16.msra.mxu1 %v2599_v9 }
  0x7c   : > { %2415 = vmatpush3.bf16.msra.mxu0 %v2600_v38  ;;  %2296 = vmatprep.subr.bf16.mxu1 %v2601_v51 }
  0x7d   : > { %2416 = vmatprep.subr.bf16.mxu0 %v2602_v52 }
  0x7f   : > { %2297 = vmatpush3.bf16.msra.mxu1 %v2601_v51 }
  0x80   : > { %2417 = vmatpush3.bf16.msra.mxu0 %v2602_v52  ;;  %2298 = vmatprep.subr.bf16.mxu1 %v2604_v53 }
  0x81   : > { %2418 = vmatprep.subr.bf16.mxu0 %v2605_v55 }
  0x83   : > { %2299 = vmatpush3.bf16.msra.mxu1 %v2604_v53 }
  0x84   : > { %2419 = vmatpush3.bf16.msra.mxu0 %v2605_v55  ;;  %2308 = vmatprep.subr.bf16.mxu1 %v2606_v7 }
  0x85   : > { %2428 = vmatprep.subr.bf16.mxu0 %v2607_v25 }
  0x86   : > { %2301 = vmatmul.mubr.bf16.vlgmr.msra.gmra.mrb[0].mxu1 %v778_v61 }
  0x87   : > { %2309 = vmatpush3.bf16.msra.mxu1 %v2606_v7  ;;  %2421 = vmatmul.mubr.bf16.vlgmr.msra.gmra.mrb[0].mxu0 %v3060_v0 }
  0x88   : > { %2429 = vmatpush3.bf16.msra.mxu0 %v2607_v25  ;;  %2310 = vmatprep.subr.bf16.mxu1 %v2608_v5 }
  0x89   : > { %2430 = vmatprep.subr.bf16.mxu0 %v2609_v14  ;;  %2304 = vmatprep.mubr.bf16.mxu1 %v779_v33 }
  0x8a   : > { %2424 = vmatprep.mubr.bf16.mxu0 %v3080_v47 }
  0x8b   : > { %2311 = vmatpush3.bf16.msra.mxu1 %v2608_v5 }
  0x8c   : > { %2431 = vmatpush3.bf16.msra.mxu0 %v2609_v14  ;;  %2312 = vmatprep.subr.bf16.mxu1 %v2610_v39 }
  0x8d   : > { %2432 = vmatprep.subr.bf16.mxu0 %v2611_v16 }
  0x8e   : > { %2305 = vmatmul.mubr.bf16.gmra.mrb[4].mxu1 %v780_v40 }
  0x8f   : > { %2313 = vmatpush3.bf16.msra.mxu1 %v2610_v39  ;;  %2425 = vmatmul.mubr.bf16.gmra.mrb[4].mxu0 %v1500_v4 }
  0x90   : > { %2433 = vmatpush3.bf16.msra.mxu0 %v2611_v16  ;;  %2314 = vmatprep.subr.bf16.mxu1 %v2612_v28 }
  0x91   : > { %2434 = vmatprep.subr.bf16.mxu0 %v2613_v37  ;;  %2324 = vmatprep.mubr.bf16.mxu1 %v1939_v56  ;;  %v2620_v56 = vld [vmem:[%s3220_s1 + $0xf8] sm:$0xff]  }
  0x92   : > { %2444 = vmatprep.mubr.bf16.mxu0 %v778_v61 }
  0x93   : > { %2315 = vmatpush3.bf16.msra.mxu1 %v2612_v28 }
  0x94   : > { %2435 = vmatpush3.bf16.msra.mxu0 %v2613_v37  ;;  %2316 = vmatprep.subr.bf16.mxu1 %v2614_v50 }
  0x95   : > { %2436 = vmatprep.subr.bf16.mxu0 %v2615_v43 }
  0x97   : > { %2317 = vmatpush3.bf16.msra.mxu1 %v2614_v50 }
  0x98   : > { %2437 = vmatpush3.bf16.msra.mxu0 %v2615_v43  ;;  %2318 = vmatprep.subr.bf16.mxu1 %v2616_v22 }
  0x99   : > { %2438 = vmatprep.subr.bf16.mxu0 %v2617_v23 }
  0x9b   : > { %2319 = vmatpush3.bf16.msra.mxu1 %v2616_v22 }
  0x9c   : > { %2439 = vmatpush3.bf16.msra.mxu0 %v2617_v23  ;;  %2320 = vmatprep.subr.bf16.mxu1 %v2618_v12 }
  0x9d   : > { %2440 = vmatprep.subr.bf16.mxu0 %v2619_v17 }
  0x9f   : > { %2321 = vmatpush3.bf16.msra.mxu1 %v2618_v12 }
  0xa0   : > { %2441 = vmatpush3.bf16.msra.mxu0 %v2619_v17  ;;  %2322 = vmatprep.subr.bf16.mxu1 %v2620_v56 }
  0xa1   : > { %2442 = vmatprep.subr.bf16.mxu0 %v2621_v26 }
  0xa3   : > { %2323 = vmatpush3.bf16.msra.mxu1 %v2620_v56 }
  0xa4   : > { %2443 = vmatpush3.bf16.msra.mxu0 %v2621_v26 }
  0xa6   : > { %2325 = vmatmul.mubr.bf16.vlgmr.msra.gmra.mrb[0].mxu1 %v1940_v57 }
  0xa7   : > { %2445 = vmatmul.mubr.bf16.vlgmr.msra.gmra.mrb[0].mxu0 %v779_v33  ;;  %2328 = vmatprep.mubr.bf16.mxu1 %v1941_v10 }
  0xa8   : > { %2448 = vmatprep.mubr.bf16.mxu0 %v780_v40 }
  0xae   : > { %2329 = vmatmul.mubr.bf16.gmra.mrb[4].mxu1 %v1942_v45 }
  0xaf   : > { %2449 = vmatmul.mubr.bf16.gmra.mrb[4].mxu0 %v1643_v34 }
 0x179   : > { %v2326_v36 = vpop.f32.mrb[0].mxu1 }
 0x17a   : > { %v2446_v20 = vpop.f32.mrb[0].mxu0  ;;  %v1022_v30 = vpop.f32.mrb[1].mxu1 }
 0x17b   : > { %v2452_v54 = vadd.f32 %v2446_v20, %v2326_v36  ;;  %v1743_v57 = vpop.f32.mrb[1].mxu0  ;;  %v2327_v63 = vpop.f32.mrb[2].mxu1 }
 0x17c   : > { %v2453_v10 = vadd.f32 %v1743_v57, %v1022_v30  ;;  %v2447_v6 = vpop.f32.mrb[2].mxu0  ;;  %v1025_v8 = vpop.f32.mrb[3].mxu1 }
 0x17d   : > { %1784 = vst [vmem:[%s3206_s25 + $0x10] sm:$0xff] %v2452_v54  ;;  %v2454_v45 = vadd.f32 %v2447_v6, %v2327_v63  ;;  %v1746_v24 = vpop.f32.mrb[3].mxu0 }
 0x17e   : > { %1782 = vst [vmem:[%s3206_s25] sm:$0xff] %v2453_v10  ;;  %v2455_v58 = vadd.f32 %v1746_v24, %v1025_v8 }
 0x17f   : > { %1785 = vst [vmem:[%s3206_s25 + $0x18] sm:$0xff] %v2454_v45 }
 0x180   : > { %1783 = vst [vmem:[%s3206_s25 + $0x8] sm:$0xff] %v2455_v58 }
 0x181   : > { %v2330_v62 = vpop.f32.mrb[4].mxu1 }
 0x182   : > { %v2450_v42 = vpop.f32.mrb[4].mxu0  ;;  %v1038_v0 = vpop.f32.mrb[5].mxu1 }
 0x183   : > { %v2456_v41 = vadd.f32 %v2450_v42, %v2330_v62  ;;  %v1759_v46 = vpop.f32.mrb[5].mxu0  ;;  %v2331_v3 = vpop.f32.mrb[6].mxu1 }
 0x184   : > { %v2457_v44 = vadd.f32 %v1759_v46, %v1038_v0  ;;  %v2451_v11 = vpop.f32.mrb[6].mxu0  ;;  %v1041_v47 = vpop.f32.mrb[7].mxu1 }
 0x185   : > { %1788 = vst [vmem:[%s3206_s25 + $0x30] sm:$0xff] %v2456_v41  ;;  %v2458_v59 = vadd.f32 %v2451_v11, %v2331_v3  ;;  %v1762_v29 = vpop.f32.mrb[7].mxu0 }
 0x186   : > { %1786 = vst [vmem:[%s3206_s25 + $0x20] sm:$0xff] %v2457_v44  ;;  %v2459_v32 = vadd.f32 %v1762_v29, %v1041_v47 }
 0x187   : > { %1789 = vst [vmem:[%s3206_s25 + $0x38] sm:$0xff] %v2458_v59 }
 0x188   : > { %1787 = vst [vmem:[%s3206_s25 + $0x28] sm:$0xff] %v2459_v32 }
 0x189 PF: > { %s14_s15 = sadd.s32 1, %s2632_s15  }
 0x18a   : > { %p11_p4 = scmp.ge.s32.totalorder %s14_s15, 4  }
 0x18c   :  { %13 = sbr.rel (!%p11_p4) target bundleno = 1 (0x1), region = 77 }

// kernel: wide_resnet_block.2
= control target key start
LH: loop header
LB: loop body
LE: loop exit
PB: predicated region body
PF: predicated region fallthrough
CT: control target
= control target key end

     0   :  { %s2812_s21 = smov 0   ;;  %s3510_s0 = inlined_call_operand.vmem [shape: bf16[2,9,9,512], index: 0, kind: input, shape index: {}]   ;;  %s3511_s1 = inlined_call_operand.vmem [shape: bf16[9,128,128], index: 1, kind: input, shape index: {}]   ;;  %s3512_s2 = inlined_call_operand.vmem [shape: f32[1,1,512], index: 2, kind: input, shape index: {}]   ;;  %s3513_s3 = inlined_call_operand.vmem [shape: f32[1,1,512], index: 3, kind: input, shape index: {}]   ;;  %s3514_s4 = inlined_call_operand.vmem [shape: f32[1,128], index: 4, kind: input, shape index: {}]   ;;  %s3515_s5 = inlined_call_operand.vmem [shape: f32[1,128], index: 5, kind: input, shape index: {}]   ;;  %s3516_s6 = inlined_call_operand.vmem [shape: bf16[2,64,128], index: 6, kind: output, shape index: {}]  }
   0x1 LB: > { %s2032_s22 = sadd.s32 4294967295, %s2775_s21   ;;  %p2036_p0 = scmp.ge.s32.totalorder %s2775_s21, 1  ;;  %s2775_s21 = sphi %s2812_s21, %s16_s21  }
   0x2   : > { %p212_p1 = scmp.lt.s32.totalorder %s2775_s21, 3 }
   0x4   : > { %p213_p2 = pnand %p2036_p0, %p212_p1 }
   0x5   : > { %v2697_v0 = vld [vmem:[%s3511_s1 + $0x40] sm:$0xff] (!%p213_p2)   ;;  %p242_p3 = scmp.lt.s32.totalorder (!%p213_p2), %s2032_s22, 1  ;;  %v2699_v2 = vld [vmem:[%s3511_s1 + $0x48] sm:$0xff] (!%p213_p2)   ;;  %v2701_v4 = vld [vmem:[%s3511_s1 + $0x50] sm:$0xff] (!%p213_p2)   ;;  %v340_v5 = vlaneseq (!%p213_p2)  ;;  %vm818_vm0 = vcmask (!%p213_p2), 1046528  }
   0x6   : > { %216 = sbr.rel (%p213_p2) target bundleno = 394 (0x18a), region = 44  ;;  %v2698_v1 = vld [vmem:[%s3511_s1 + $0x100] sm:$0xff] (!%p213_p2)   ;;  %2392 = vmatprep.subr.bf16.mxu1 (!%p213_p2), %v2697_v0  ;;  %v2700_v3 = vld [vmem:[%s3511_s1 + $0x108] sm:$0xff] (!%p213_p2)   ;;  %v2702_v6 = vld [vmem:[%s3511_s1 + $0x110] sm:$0xff] (!%p213_p2)  }
   0x7   : > { %2488 = vmatprep.subr.bf16.mxu0 (!%p213_p2), %v2698_v1  ;;  %2393 = vmatpush3.bf16.msra.mxu1 (!%p213_p2), %v2697_v0  ;;  %v2703_v7 = vld [vmem:[%s3511_s1 + $0x58] sm:$0xff] (!%p213_p2)   ;;  %v341_v8 = vshrl.u32 (!%p213_p2), %v340_v5, 7  ;;  %v2705_v10 = vld [vmem:[%s3511_s1 + $0x60] sm:$0xff] (!%p213_p2)   ;;  %v2707_v14 = vld [vmem:[%s3511_s1 + $0x68] sm:$0xff] (!%p213_p2)  }
   0x8   : > { %2489 = vmatpush3.bf16.msra.mxu0 (!%p213_p2), %v2698_v1  ;;  %2394 = vmatprep.subr.bf16.mxu1 (!%p213_p2), %v2699_v2  ;;  %v2704_v9 = vld [vmem:[%s3511_s1 + $0x118] sm:$0xff] (!%p213_p2)   ;;  %v2706_v12 = vld [vmem:[%s3511_s1 + $0x120] sm:$0xff] (!%p213_p2)   ;;  %v2708_v16 = vld [vmem:[%s3511_s1 + $0x128] sm:$0xff] (!%p213_p2)  }
   0x9   : > { %2490 = vmatprep.subr.bf16.mxu0 (!%p213_p2), %v2700_v3  ;;  %v342_v11 = vsub.s32 (!%p213_p2), 0, %v341_v8  ;;  %v346_v13 = vsub.s32 (!%p213_p2), 1, %v341_v8  ;;  %v350_v15 = vsub.s32 (!%p213_p2), 2, %v341_v8  ;;  %v338_v19 = vld [vmem:[%s3512_s2] sm:$0xf] (!%p213_p2)  ;;  %v354_v20 = vsub.s32 (!%p213_p2), 3, %v341_v8 }
   0xa   : > { %v411_v25 = vld [vmem:[%s3513_s3] sm:$0xf] (!%p213_p2)  ;;  %v2709_v36 = vld [vmem:[%s3511_s1 + $0x70] sm:$0xff] (!%p213_p2)   ;;  %v2711_v48 = vld [vmem:[%s3511_s1 + $0x78] sm:$0xff] (!%p213_p2)  }
   0xb   : > { %2395 = vmatpush3.bf16.msra.mxu1 (!%p213_p2), %v2699_v2  ;;  %v2876_v26 = vrot.slane (!%p213_p2), %v338_v19, %v342_v11  ;;  %v2878_v27 = vrot.slane (!%p213_p2), %v338_v19, %v346_v13  ;;  %v2880_v28 = vrot.slane (!%p213_p2), %v338_v19, %v350_v15  ;;  %v2882_v29 = vrot.slane (!%p213_p2), %v411_v25, %v342_v11  ;;  %v2710_v37 = vld [vmem:[%s3511_s1 + $0x130] sm:$0xff] (!%p213_p2)   ;;  %v2712_v53 = vld [vmem:[%s3511_s1 + $0x138] sm:$0xff] (!%p213_p2)   ;;  %v2713_v8 = vld [vmem:[%s3511_s1] sm:$0xff] (!%p213_p2)  }
   0xc   : > { %2491 = vmatpush3.bf16.msra.mxu0 (!%p213_p2), %v2700_v3  ;;  %2396 = vmatprep.subr.bf16.mxu1 (!%p213_p2), %v2701_v4  ;;  %v2886_v32 = vrot.slane (!%p213_p2), %v411_v25, %v346_v13  ;;  %v2888_v33 = vrot.slane (!%p213_p2), %v411_v25, %v350_v15  ;;  %v2902_v44 = vrot.slane (!%p213_p2), %v338_v19, %v354_v20  ;;  %v2714_v19 = vld [vmem:[%s3511_s1 + $0x140] sm:$0xff] (!%p213_p2)  }
   0xd   : > { %s3522_s22 = smov (!%p242_p3, %s2032_s22), 1  ;;  %2492 = vmatprep.subr.bf16.mxu0 %v2702_v6  ;;  %v2907_v46 = vrot.slane %v411_v25, %v354_v20 }
   0xe   : > { %s2688_s15 = smul.u32 288, %s3522_s22 }
   0xf   : > { %2397 = vmatpush3.bf16.msra.mxu1 %v2701_v4 }
  0x10   : > { %2493 = vmatpush3.bf16.msra.mxu0 %v2702_v6  ;;  %2398 = vmatprep.subr.bf16.mxu1 %v2703_v7  ;;  %s2856_s24 = scalar_lea.vmem %s3510_s0, %s2688_s15 }
  0x11   : > { %2494 = vmatprep.subr.bf16.mxu0 %v2704_v9  ;;  %v2865_v17 = vld [vmem:[%s2856_s24] sm:$0xff]  ;;  %v254_v30 = vld [vmem:[%s2856_s24 + $0x8] sm:$0xff] }
  0x12   : > { %v257_v18 = vld [vmem:[%s2856_s24 + $0x20] sm:$0xff]  ;;  %v287_v21 = vunpack.c.l.bf16 %v2865_v17  ;;  %v288_v22 = vunpack.c.h.bf16 %v2865_v17  ;;  %v258_v31 = vld [vmem:[%s2856_s24 + $0x28] sm:$0xff]  ;;  %v289_v34 = vunpack.c.l.bf16 %v254_v30  ;;  %v290_v35 = vunpack.c.h.bf16 %v254_v30 }
  0x13   : > { %2399 = vmatpush3.bf16.msra.mxu1 %v2703_v7  ;;  %v293_v23 = vunpack.c.l.bf16 %v257_v18  ;;  %v294_v24 = vunpack.c.h.bf16 %v257_v18  ;;  %v295_v41 = vunpack.c.l.bf16 %v258_v31  ;;  %v261_v42 = vld [vmem:[%s2856_s24 + $0x40] sm:$0xff]  ;;  %v296_v43 = vunpack.c.h.bf16 %v258_v31  ;;  %v262_v62 = vld [vmem:[%s2856_s24 + $0x48] sm:$0xff] }
  0x14   : > { %2495 = vmatpush3.bf16.msra.mxu0 %v2704_v9  ;;  %2400 = vmatprep.subr.bf16.mxu1 %v2705_v10  ;;  %v361_v38 = vmul.f32 %v2878_v27, %v288_v22  ;;  %v2905_v45 = vmul.f32 %v2880_v28, %v289_v34  ;;  %v265_v47 = vld [vmem:[%s2856_s24 + $0x60] sm:$0xff]  ;;  %v299_v52 = vunpack.c.l.bf16 %v261_v42  ;;  %v363_v54 = vmul.f32 %v2902_v44, %v290_v35  ;;  %v266_v63 = vld [vmem:[%s2856_s24 + $0x68] sm:$0xff] }
  0x15   : > { %2496 = vmatprep.subr.bf16.mxu0 %v2706_v12  ;;  %v2898_v39 = vmul.f32 %v2876_v26, %v293_v23  ;;  %v367_v40 = vmul.f32 %v2878_v27, %v294_v24  ;;  %v2918_v51 = vmul.f32 %v2880_v28, %v295_v41  ;;  %v369_v55 = vmul.f32 %v2902_v44, %v296_v43  ;;  %v2965_v35 = vld [vmem:[%s2856_s24 + $0x80] sm:$0xff]  ;;  %v2715_v41 = vld [vmem:[%s3511_s1 + $0x8] sm:$0xff]  }
  0x16   : > { %v434_v49 = vadd.f32 %v2886_v32, %v361_v38  ;;  %v300_v56 = vunpack.c.h.bf16 %v261_v42  ;;  %v305_v57 = vunpack.c.l.bf16 %v265_v47  ;;  %v306_v60 = vunpack.c.h.bf16 %v265_v47  ;;  %v2968_v17 = vld [vmem:[%s2856_s24 + $0xa0] sm:$0xff]  ;;  %v2992_v47 = vld [vmem:[%s2856_s24 + $0x88] sm:$0xff] }
  0x17   : > { %2401 = vmatpush3.bf16.msra.mxu1 %v2705_v10  ;;  %v2915_v50 = vadd.f32 %v2886_v32, %v367_v40  ;;  %v372_v61 = vmul.f32 %v2876_v26, %v299_v52  ;;  %v436_v0 = vadd.f32 %v2907_v46, %v363_v54  ;;  %v442_v1 = vadd.f32 %v2907_v46, %v369_v55 }
  0x18   : > { %2497 = vmatpush3.bf16.msra.mxu0 %v2706_v12  ;;  %2402 = vmatprep.subr.bf16.mxu1 %v2707_v14  ;;  %v485_v58 = vmax.f32 %v434_v49, 0.0  ;;  %v373_v2 = vmul.f32 %v2878_v27, %v300_v56  ;;  %v378_v3 = vmul.f32 %v2876_v26, %v305_v57  ;;  %v379_v5 = vmul.f32 %v2878_v27, %v306_v60  ;;  %v3003_v56 = vld [vmem:[%s2856_s24 + $0xc0] sm:$0xff]  ;;  %v2717_v60 = vld [vmem:[%s3511_s1 + $0x10] sm:$0xff]  }
  0x19   : > { %2498 = vmatprep.subr.bf16.mxu0 %v2708_v16  ;;  %v491_v59 = vmax.f32 %v2915_v50, 0.0  ;;  %v445_v6 = vadd.f32 %v2882_v29, %v372_v61  ;;  %v301_v7 = vunpack.c.l.bf16 %v262_v62  ;;  %v487_v9 = vmax.f32 %v436_v0, 0.0 }
  0x1a   : > { %v493_v10 = vmax.f32 %v442_v1, 0.0  ;;  %v2941_v11 = vadd.f32 %v2886_v32, %v373_v2  ;;  %v2944_v12 = vadd.f32 %v2882_v29, %v378_v3  ;;  %v2947_v13 = vadd.f32 %v2886_v32, %v379_v5 }
  0x1b   : > { %2403 = vmatpush3.bf16.msra.mxu1 %v2707_v14  ;;  %v555_v4 = vpack.c.bf16 %v491_v59, %v485_v58  ;;  %v302_v14 = vunpack.c.h.bf16 %v262_v62  ;;  %v307_v15 = vunpack.c.l.bf16 %v266_v63  ;;  %v374_v22 = vmul.f32 %v2880_v28, %v301_v7 }
  0x1c   : > { %2499 = vmatpush3.bf16.msra.mxu0 %v2708_v16  ;;  %2404 = vmatprep.subr.bf16.mxu1 %v2709_v36  ;;  %v308_v16 = vunpack.c.h.bf16 %v266_v63  ;;  %v1135_v18 = vpack.c.bf16 %v493_v10, %v487_v9  ;;  %v497_v20 = vmax.f32 %v2941_v11, 0.0  ;;  %v360_v23 = vmul.f32 %v2876_v26, %v287_v21  ;;  %v3012_v63 = vld [vmem:[%s2856_s24 + $0xe0] sm:$0xff] }
  0x1d   : > { %2500 = vmatprep.subr.bf16.mxu0 %v2710_v37  ;;  %2408 = vmatprep.mubr.bf16.mxu1 %v555_v4  ;;  %v503_v24 = vmax.f32 %v2947_v13, 0.0  ;;  %v375_v25 = vmul.f32 %v2902_v44, %v302_v14  ;;  %v380_v30 = vmul.f32 %v2880_v28, %v307_v15  ;;  %v2962_v34 = vadd.f32 %v2888_v33, %v374_v22  ;;  %v3019_v4 = vld [vmem:[%s2856_s24 + $0xc8] sm:$0xff]  ;;  %v2720_v13 = vld [vmem:[%s3511_s1 + $0x158] sm:$0xff]  }
  0x1e   : > { %v381_v31 = vmul.f32 %v2902_v44, %v308_v16  ;;  %2504 = vmatprep.mubr.bf16.mxu0 %v1135_v18  ;;  %v2971_v21 = vadd.f32 %v2882_v29, %v360_v23  ;;  %v311_v42 = vunpack.c.l.bf16 %v2965_v35  ;;  %v312_v43 = vunpack.c.h.bf16 %v2965_v35  ;;  %v3034_v18 = vld [vmem:[%s2856_s24 + $0xe8] sm:$0xff] }
  0x1f   : > { %2405 = vmatpush3.bf16.msra.mxu1 %v2709_v36  ;;  %v2975_v36 = vadd.f32 %v2882_v29, %v2898_v39  ;;  %v448_v38 = vadd.f32 %v2907_v46, %v375_v25  ;;  %v2983_v40 = vadd.f32 %v2888_v33, %v380_v30  ;;  %v2997_v49 = vmax.f32 %v445_v6, 0.0  ;;  %v2716_v6 = vld [vmem:[%s3511_s1 + $0x148] sm:$0xff]  }
  0x20   : > { %2501 = vmatpush3.bf16.msra.mxu0 %v2710_v37  ;;  %2406 = vmatprep.subr.bf16.mxu1 %v2711_v48  ;;  %v556_v37 = vpack.c.bf16 %v503_v24, %v497_v20  ;;  %v454_v39 = vadd.f32 %v2907_v46, %v381_v31  ;;  %v498_v52 = vmax.f32 %v2962_v34, 0.0  ;;  %v317_v54 = vunpack.c.l.bf16 %v2968_v17  ;;  %v2719_v31 = vld [vmem:[%s3511_s1 + $0x18] sm:$0xff]   ;;  %v2763_v34 = vld [vmem:[%s3511_s1 + $0x210] sm:$0xff]  }
  0x21   : > { %2502 = vmatprep.subr.bf16.mxu0 %v2712_v53  ;;  %v318_v55 = vunpack.c.h.bf16 %v2968_v17  ;;  %v504_v57 = vmax.f32 %v2983_v40, 0.0  ;;  %v385_v61 = vmul.f32 %v2878_v27, %v312_v43  ;;  %v314_v62 = vunpack.c.h.bf16 %v2992_v47  ;;  %v2718_v43 = vld [vmem:[%s3511_s1 + $0x150] sm:$0xff]   ;;  %v276_v17 = vld [vmem:[%s2856_s24 + $0xb8] sm:$0x1] }
  0x22   : > { %v505_v58 = vmax.f32 %v454_v39, 0.0  ;;  %v313_v1 = vunpack.c.l.bf16 %v2992_v47  ;;  %v324_v3 = vunpack.c.h.bf16 %v3003_v56  ;;  %v330_v15 = vunpack.c.h.bf16 %v3012_v63 }
  0x23   : > { %2407 = vmatpush3.bf16.msra.mxu1 %v2711_v48  ;;  %v2995_v48 = vld [vmem:[%s2856_s24 + $0xa8] sm:$0xff]  ;;  %v391_v0 = vmul.f32 %v2878_v27, %v318_v55  ;;  %v458_v7 = vadd.f32 %v2886_v32, %v385_v61  ;;  %v387_v9 = vmul.f32 %v2902_v44, %v314_v62  ;;  %v323_v25 = vunpack.c.l.bf16 %v3003_v56  ;;  %v256_v61 = vld [vmem:[%s2856_s24 + $0x18] sm:$0x1]  ;;  %v2729_v56 = vld [vmem:[%s3511_s1 + $0x80] sm:$0xff]  }
  0x24   : > { %2503 = vmatpush3.bf16.msra.mxu0 %v2712_v53  ;;  %2416 = vmatprep.subr.bf16.mxu1 %v2713_v8  ;;  %v499_v53 = vmax.f32 %v448_v38, 0.0  ;;  %v320_v2 = vunpack.c.h.bf16 %v2995_v48  ;;  %v397_v16 = vmul.f32 %v2878_v27, %v324_v3  ;;  %v326_v30 = vunpack.c.h.bf16 %v3019_v4  ;;  %v260_v62 = vld [vmem:[%s2856_s24 + $0x38] sm:$0x1] }
  0x25   : > { %2512 = vmatprep.subr.bf16.mxu0 %v2714_v19  ;;  %v3028_v10 = vadd.f32 %v2886_v32, %v391_v0  ;;  %v509_v22 = vmax.f32 %v458_v7, 0.0  ;;  %v460_v23 = vadd.f32 %v2907_v46, %v387_v9  ;;  %v329_v55 = vunpack.c.l.bf16 %v3012_v63 }
  0x26   : > { %2409 = vmatmul.mubr.bf16.vlgmr.msra.gmra.mrb[0].mxu1 %v556_v37  ;;  %v1136_v5 = vpack.c.bf16 %v505_v58, %v499_v53  ;;  %v393_v14 = vmul.f32 %v2902_v44, %v320_v2  ;;  %v3046_v39 = vadd.f32 %v2886_v32, %v397_v16  ;;  %v332_v58 = vunpack.c.h.bf16 %v3034_v18 }
  0x27   : > { %2417 = vmatpush3.bf16.msra.mxu1 %v2713_v8  ;;  %v319_v8 = vunpack.c.l.bf16 %v2995_v48  ;;  %v515_v37 = vmax.f32 %v3028_v10, 0.0  ;;  %v511_v53 = vmax.f32 %v460_v23, 0.0  ;;  %v484_v9 = vmax.f32 %v2971_v21, 0.0  ;;  %v2726_v48 = vld [vmem:[%s3511_s1 + $0x170] sm:$0xff]  }
  0x28   : > { %2418 = vmatprep.subr.bf16.mxu1 %v2715_v41  ;;  %2505 = vmatmul.mubr.bf16.vlgmr.msra.gmra.mrb[0].mxu0 %v1136_v5  ;;  %v466_v38 = vadd.f32 %v2907_v46, %v393_v14  ;;  %v3518_v5 = vmax.f32 %v3046_v39, 0.0  ;;  %v405_v7 = vmul.f32 %v2902_v44, %v332_v58  ;;  %v3072_v14 = vmax.f32 %v2975_v36, 0.0 }
  0x29   : > { %2513 = vmatpush3.bf16.msra.mxu0 %v2714_v19  ;;  %v3053_v19 = vpack.c.bf16 %v509_v22, %v503_v24  ;;  %v557_v0 = vpack.c.bf16 %v515_v37, %v509_v22  ;;  %v399_v24 = vmul.f32 %v2902_v44, %v326_v30  ;;  %v292_v22 = vunpack.c.l.bf16 %v256_v61 }
  0x2a   : > { %2514 = vmatprep.subr.bf16.mxu0 %v2716_v6  ;;  %v517_v2 = vmax.f32 %v466_v38, 0.0  ;;  %v298_v23 = vunpack.c.l.bf16 %v260_v62  ;;  %v325_v44 = vunpack.c.l.bf16 %v3019_v4  ;;  %v478_v30 = vadd.f32 %v2907_v46, %v405_v7  ;;  %v264_v38 = vld [vmem:[%s2856_s24 + $0x58] sm:$0x1]  ;;  %v2722_v62 = vld [vmem:[%s3511_s1 + $0x160] sm:$0xff]  }
  0x2b   : > { %2419 = vmatpush3.bf16.msra.mxu1 %v2715_v41  ;;  %v403_v41 = vmul.f32 %v2878_v27, %v330_v15  ;;  %2412 = vmatprep.mubr.bf16.mxu1 %v557_v0  ;;  %v472_v36 = vadd.f32 %v2907_v46, %v399_v24  ;;  %v3093_v61 = vadd.f32 %v2888_v33, %v2905_v45  ;;  %v268_v46 = vld [vmem:[%s2856_s24 + $0x78] sm:$0x1]  ;;  %v331_v0 = vunpack.c.l.bf16 %v3034_v18  ;;  %v2723_v45 = vld [vmem:[%s3511_s1 + $0x28] sm:$0xff]  }
  0x2c   : > { %2420 = vmatprep.subr.bf16.mxu1 %v2717_v60  ;;  %v1137_v15 = vpack.c.bf16 %v517_v2, %v511_v53  ;;  %v365_v53 = vmul.f32 %v2880_v28, %v292_v22  ;;  %v371_v58 = vmul.f32 %v2880_v28, %v298_v23  ;;  %v529_v24 = vmax.f32 %v478_v30, 0.0 }
  0x2d   : > { %v3062_v3 = vadd.f32 %v2886_v32, %v403_v41  ;;  %2515 = vmatpush3.bf16.msra.mxu0 %v2716_v6  ;;  %v535_v6 = vpack.c.bf16 %v3072_v14, %v484_v9  ;;  %v523_v2 = vmax.f32 %v472_v36, 0.0  ;;  %v3102_v7 = vadd.f32 %v2888_v33, %v2918_v51 }
  0x2e   : > { %2516 = vmatprep.subr.bf16.mxu0 %v2718_v43  ;;  %2508 = vmatprep.mubr.bf16.mxu0 %v1137_v15  ;;  %v444_v15 = vadd.f32 %v2888_v33, %v371_v58  ;;  %v486_v22 = vmax.f32 %v3093_v61, 0.0  ;;  %v304_v23 = vunpack.c.l.bf16 %v264_v38  ;;  %v3112_v51 = vmax.f32 %v2944_v12, 0.0  ;;  %v2724_v38 = vld [vmem:[%s3511_s1 + $0x168] sm:$0xff]  }
  0x2f   : > { %2421 = vmatpush3.bf16.msra.mxu1 %v2717_v60  ;;  %v2721_v60 = vld [vmem:[%s3511_s1 + $0x20] sm:$0xff]   ;;  %v3517_v16 = vmax.f32 %v3062_v3, 0.0  ;;  %v1138_v36 = vpack.c.bf16 %v529_v24, %v523_v2  ;;  %v492_v30 = vmax.f32 %v3102_v7, 0.0  ;;  %v398_v63 = vmul.f32 %v2880_v28, %v325_v44 }
  0x30   : > { %2422 = vmatprep.subr.bf16.mxu1 %v2719_v31  ;;  %v377_v58 = vmul.f32 %v2880_v28, %v304_v23  ;;  %v2753_v7 = vld [vmem:[%s3511_s1 + $0xe0] sm:$0xff]  }
  0x31   : > { %v558_v41 = vpack.c.bf16 %v3517_v16, %v3518_v5  ;;  %2517 = vmatpush3.bf16.msra.mxu0 %v2718_v43  ;;  %v310_v43 = vunpack.c.l.bf16 %v268_v46  ;;  %v495_v5 = vmax.f32 %v444_v15, 0.0  ;;  %v1296_v12 = vrot.slane %v492_v30, 1 }
  0x32   : > { %2518 = vmatprep.subr.bf16.mxu0 %v2720_v13  ;;  %2509 = vmatmul.mubr.bf16.gmra.mrb[4].mxu0 %v1138_v36  ;;  %v1299_v46 = vrot.slane %v498_v52, 1  ;;  %v384_v15 = vmul.f32 %v2876_v26, %v311_v42  ;;  %v390_v36 = vmul.f32 %v2876_v26, %v317_v54 }
  0x33   : > { %2423 = vmatpush3.bf16.msra.mxu1 %v2719_v31  ;;  %v438_v31 = vadd.f32 %v2888_v33, %v365_v53  ;;  %v1293_v53 = vrot.slane %v486_v22, 1  ;;  %v1297_v24 = vrot.slane %v495_v5, 1  ;;  %v392_v5 = vmul.f32 %v2880_v28, %v319_v8  ;;  %v2727_v8 = vld [vmem:[%s3511_s1 + $0x38] sm:$0xff]  }
  0x34   : > { %2424 = vmatprep.subr.bf16.mxu1 %v2721_v60  ;;  %2413 = vmatmul.mubr.bf16.gmra.mrb[4].mxu1 %v558_v41  ;;  %v2725_v41 = vld [vmem:[%s3511_s1 + $0x30] sm:$0xff]   ;;  %v463_v47 = vadd.f32 %v2882_v29, %v390_v36  ;;  %v536_v36 = vpack.c.bf16 %v3112_v51, %v2997_v49 }
  0x35   : > { %2432 = vmatprep.mubr.bf16.mxu1 %v535_v6  ;;  %v489_v16 = vmax.f32 %v438_v31, 0.0  ;;  %v383_v6 = vmul.f32 %v2880_v28, %v310_v43  ;;  %2519 = vmatpush3.bf16.msra.mxu0 %v2720_v13  ;;  %v450_v31 = vadd.f32 %v2888_v33, %v377_v58  ;;  %v386_v13 = vmul.f32 %v2880_v28, %v313_v1  ;;  %v272_v58 = vld [vmem:[%s2856_s24 + $0x98] sm:$0x1] }
  0x36   : > { %2520 = vmatprep.subr.bf16.mxu0 %v2722_v62  ;;  %v1298_v35 = vsel %vm818_vm0, %v1296_v12, %v1297_v24  ;;  %v457_v43 = vadd.f32 %v2882_v29, %v384_v15  ;;  %v316_v1 = vunpack.c.l.bf16 %v272_v58  ;;  %v280_v24 = vld [vmem:[%s2856_s24 + $0xd8] sm:$0x1] }
  0x37   : > { %2425 = vmatpush3.bf16.msra.mxu1 %v2721_v60  ;;  %v1302_v60 = vrot.slane %v504_v57, 1  ;;  %v1294_v2 = vrot.slane %v489_v16, 1  ;;  %v456_v23 = vadd.f32 %v2888_v33, %v383_v6  ;;  %v501_v42 = vmax.f32 %v450_v31, 0.0 }
  0x38   : > { %2426 = vmatprep.subr.bf16.mxu1 %v2723_v45  ;;  %v3156_v12 = vmax.f32 %v457_v43, 0.0  ;;  %v3162_v31 = vmax.f32 %v463_v47, 0.0  ;;  %v389_v15 = vmul.f32 %v2880_v28, %v316_v1  ;;  %v328_v1 = vunpack.c.l.bf16 %v280_v24 }
  0x39   : > { %v1295_v16 = vsel %vm818_vm0, %v1293_v53, %v1294_v2  ;;  %v507_v6 = vmax.f32 %v456_v23, 0.0  ;;  %2521 = vmatpush3.bf16.msra.mxu0 %v2722_v62  ;;  %v1300_v53 = vrot.slane %v501_v42, 1  ;;  %v322_v2 = vunpack.c.l.bf16 %v276_v17  ;;  %v2728_v42 = vld [vmem:[%s3511_s1 + $0x178] sm:$0xff]  }
  0x3a   : > { %v1325_v54 = vpack.c.bf16 %v1298_v35, %v1295_v16  ;;  %2522 = vmatprep.subr.bf16.mxu0 %v2724_v38  ;;  %v3166_v23 = vadd.f32 %v2888_v33, %v392_v5  ;;  %v396_v35 = vmul.f32 %v2876_v26, %v323_v25  ;;  %v462_v58 = vadd.f32 %v2888_v33, %v389_v15 }
  0x3b   : > { %2427 = vmatpush3.bf16.msra.mxu1 %v2723_v45  ;;  %v3159_v45 = vadd.f32 %v2888_v33, %v386_v13  ;;  %v1303_v62 = vrot.slane %v507_v6, 1  ;;  %v395_v16 = vmul.f32 %v2880_v28, %v322_v2  ;;  %v3179_v43 = vsel %vm818_vm0, %v1299_v46, %v1300_v53  ;;  %v2731_v53 = vld [vmem:[%s3511_s1 + $0x88] sm:$0xff]  }
  0x3c   : > { %2428 = vmatprep.subr.bf16.mxu1 %v2725_v41  ;;  %2528 = vmatprep.mubr.bf16.mxu0 %v1325_v54  ;;  %v516_v17 = vmax.f32 %v3166_v23, 0.0  ;;  %v284_v54 = vld [vmem:[%s2856_s24 + $0xf8] sm:$0x1]  ;;  %v537_v25 = vpack.c.bf16 %v3162_v31, %v3156_v12  ;;  %v469_v47 = vadd.f32 %v2882_v29, %v396_v35  ;;  %v2767_v23 = vld [vmem:[%s3511_s1 + $0x230] sm:$0xff]  }
  0x3d   : > { %v510_v13 = vmax.f32 %v3159_v45, 0.0  ;;  %v3182_v5 = vsel %vm818_vm0, %v1302_v60, %v1303_v62  ;;  %2523 = vmatpush3.bf16.msra.mxu0 %v2724_v38  ;;  %v402_v60 = vmul.f32 %v2876_v26, %v329_v55  ;;  %v513_v38 = vmax.f32 %v462_v58, 0.0  ;;  %v255_v55 = vld [vmem:[%s2856_s24 + $0x10] sm:$0x1]  ;;  %v2766_v45 = vld [vmem:[%s3511_s1 + $0x228] sm:$0xff]  }
  0x3e   : > { %2524 = vmatprep.subr.bf16.mxu0 %v2726_v48  ;;  %v1308_v6 = vrot.slane %v516_v17, 1  ;;  %v334_v15 = vunpack.c.l.bf16 %v284_v54  ;;  %v3212_v35 = vmax.f32 %v469_v47, 0.0  ;;  %v401_v58 = vmul.f32 %v2880_v28, %v328_v1 }
  0x3f   : > { %2429 = vmatpush3.bf16.msra.mxu1 %v2725_v41  ;;  %v468_v41 = vadd.f32 %v2888_v33, %v395_v16  ;;  %v1305_v46 = vrot.slane %v510_v13, 1  ;;  %v475_v62 = vadd.f32 %v2882_v29, %v402_v60  ;;  %v2730_v16 = vld [vmem:[%s3511_s1 + $0x180] sm:$0xff]   ;;  %v1306_v24 = vrot.slane %v513_v38, 1  ;;  %v259_v60 = vld [vmem:[%s2856_s24 + $0x30] sm:$0x1] }
  0x40   : > { %2430 = vmatprep.subr.bf16.mxu1 %v2727_v8  ;;  %v404_v54 = vmul.f32 %v2880_v28, %v331_v0  ;;  %v474_v38 = vadd.f32 %v2888_v33, %v401_v58  ;;  %v291_v18 = vunpack.c.l.bf16 %v255_v55  ;;  %v263_v0 = vld [vmem:[%s2856_s24 + $0x50] sm:$0x1]  ;;  %v297_v58 = vunpack.c.l.bf16 %v259_v60 }
  0x41   : > { %v519_v2 = vmax.f32 %v468_v41, 0.0  ;;  %2525 = vmatpush3.bf16.msra.mxu0 %v2726_v48  ;;  %v3218_v44 = vmax.f32 %v475_v62, 0.0  ;;  %v3222_v41 = vadd.f32 %v2888_v33, %v398_v63  ;;  %v1307_v48 = vsel %vm818_vm0, %v1305_v46, %v1306_v24  ;;  %v267_v55 = vld [vmem:[%s2856_s24 + $0x70] sm:$0x1] }
  0x42   : > { %2526 = vmatprep.subr.bf16.mxu0 %v2728_v42  ;;  %v3227_v47 = vadd.f32 %v2888_v33, %v404_v54  ;;  %v1326_v62 = vpack.c.bf16 %v3182_v5, %v3179_v43  ;;  %v370_v24 = vmul.f32 %v2876_v26, %v297_v58  ;;  %v309_v60 = vunpack.c.l.bf16 %v267_v55  ;;  %v271_v55 = vld [vmem:[%s2856_s24 + $0x90] sm:$0x1] }
  0x43   : > { %2431 = vmatpush3.bf16.msra.mxu1 %v2727_v8  ;;  %v1309_v4 = vrot.slane %v519_v2, 1  ;;  %v407_v8 = vmul.f32 %v2880_v28, %v334_v15  ;;  %v522_v2 = vmax.f32 %v3222_v41, 0.0  ;;  %v525_v15 = vmax.f32 %v474_v38, 0.0 }
  0x44   : > { %2440 = vmatprep.subr.bf16.mxu1 %v2729_v56  ;;  %v528_v63 = vmax.f32 %v3227_v47, 0.0  ;;  %v819_v38 = vrot.slane %v484_v9, 1 }
  0x45   : > { %v1310_v1 = vsel %vm818_vm0, %v1308_v6, %v1309_v4  ;;  %v480_v28 = vadd.f32 %v2888_v33, %v407_v8  ;;  %2527 = vmatpush3.bf16.msra.mxu0 %v2728_v42  ;;  %v2733_v33 = vld [vmem:[%s3511_s1 + $0x90] sm:$0xff]   ;;  %v1311_v5 = vrot.slane %v522_v2, 1  ;;  %v1312_v46 = vrot.slane %v525_v15, 1 }
  0x46   : > { %2433 = vmatmul.mubr.bf16.vlgmr.msra.gmra.mrb[0].mxu1 %v536_v36  ;;  %v2732_v36 = vld [vmem:[%s3511_s1 + $0x188] sm:$0xff]   ;;  %2536 = vmatprep.subr.bf16.mxu0 %v2730_v16  ;;  %v1327_v42 = vpack.c.bf16 %v1310_v1, %v1307_v48  ;;  %v1314_v6 = vrot.slane %v528_v63, 1  ;;  %v303_v8 = vunpack.c.l.bf16 %v263_v0  ;;  %v443_v1 = vadd.f32 %v2882_v29, %v370_v24  ;;  %v2735_v0 = vld [vmem:[%s3511_s1 + $0x98] sm:$0xff]   ;;  %v279_v24 = vld [vmem:[%s2856_s24 + $0xd0] sm:$0x1] }
  0x47   : > { %2441 = vmatpush3.bf16.msra.mxu1 %v2729_v56  ;;  %2436 = vmatprep.mubr.bf16.mxu1 %v537_v25  ;;  %v538_v56 = vpack.c.bf16 %v3218_v44, %v3212_v35  ;;  %v531_v43 = vmax.f32 %v480_v28, 0.0  ;;  %v364_v25 = vmul.f32 %v2876_v26, %v291_v18  ;;  %v2734_v18 = vld [vmem:[%s3511_s1 + $0x190] sm:$0xff]   ;;  %v1313_v48 = vsel %vm818_vm0, %v1311_v5, %v1312_v46 }
  0x48   : > { %2442 = vmatprep.subr.bf16.mxu1 %v2731_v53  ;;  %2529 = vmatmul.mubr.bf16.vlgmr.msra.gmra.mrb[0].mxu0 %v1326_v62  ;;  %v382_v28 = vmul.f32 %v2876_v26, %v309_v60  ;;  %v494_v62 = vmax.f32 %v443_v1, 0.0  ;;  %v822_v15 = vrot.slane %v3072_v14, 1  ;;  %v315_v46 = vunpack.c.l.bf16 %v271_v55  ;;  %v286_v60 = vld [vmem:[%s2856_s24 + $0x110] sm:$0x1] }
  0x49   : > { %v1315_v54 = vrot.slane %v531_v43, 1  ;;  %v437_v4 = vadd.f32 %v2882_v29, %v364_v25  ;;  %2537 = vmatpush3.bf16.msra.mxu0 %v2730_v16  ;;  %2532 = vmatprep.mubr.bf16.mxu0 %v1327_v42  ;;  %v275_v43 = vld [vmem:[%s2856_s24 + $0xb0] sm:$0x1]  ;;  %v337_v55 = vunpack.c.l.bf16 %v286_v60  ;;  %v996_v40 = vpack.c.bf16 %v528_v63, %v522_v2 }
  0x4a   : > { %2538 = vmatprep.subr.bf16.mxu0 %v2732_v36  ;;  %v455_v58 = vadd.f32 %v2882_v29, %v382_v28  ;;  %v823_v25 = vrot.slane %v494_v62, 1  ;;  %v388_v1 = vmul.f32 %v2876_v26, %v315_v46  ;;  %v2739_v62 = vld [vmem:[%s3511_s1 + $0xa8] sm:$0xff]   ;;  %v831_v46 = vrot.slane %v3156_v12, 1 }
  0x4b   : > { %2443 = vmatpush3.bf16.msra.mxu1 %v2731_v53  ;;  %v1316_v21 = vsel %vm818_vm0, %v1314_v6, %v1315_v54  ;;  %v488_v9 = vmax.f32 %v437_v4, 0.0  ;;  %v376_v53 = vmul.f32 %v2876_v26, %v303_v8  ;;  %v321_v6 = vunpack.c.l.bf16 %v275_v43  ;;  %v283_v54 = vld [vmem:[%s2856_s24 + $0xf0] sm:$0x1]  ;;  %v3278_v8 = vld [vmem:[%s2856_s24 + $0x100] sm:$0xff]  ;;  %s2252_s24 = sshll.u32 %s3522_s22, 5 }
  0x4c   : > { %2444 = vmatprep.subr.bf16.mxu1 %v2733_v33  ;;  %v1328_v5 = vpack.c.bf16 %v1316_v21, %v1313_v48  ;;  %v3285_v48 = vsel %vm818_vm0, %v822_v15, %v823_v25  ;;  %v333_v28 = vunpack.c.l.bf16 %v283_v54  ;;  %v461_v15 = vadd.f32 %v2882_v29, %v388_v1  ;;  %s251_s30 = scalar_lea.vmem %s3516_s6, %s2252_s24 }
  0x4d   : > { %v820_v16 = vrot.slane %v488_v9, 1  ;;  %2539 = vmatpush3.bf16.msra.mxu0 %v2732_v36  ;;  %v449_v4 = vadd.f32 %v2882_v29, %v376_v53  ;;  %v506_v36 = vmax.f32 %v455_v58, 0.0  ;;  %v394_v21 = vmul.f32 %v2876_v26, %v321_v6 }
  0x4e   : > { %2437 = vmatmul.mubr.bf16.gmra.mrb[4].mxu1 %v538_v56  ;;  %v2737_v56 = vld [vmem:[%s3511_s1 + $0xa0] sm:$0xff]   ;;  %2540 = vmatprep.subr.bf16.mxu0 %v2734_v18  ;;  %v1467_v9 = vpack.c.bf16 %v2997_v49, %v3072_v14  ;;  %v327_v53 = vunpack.c.l.bf16 %v279_v24  ;;  %v335_v58 = vunpack.c.l.bf16 %v3278_v8  ;;  %v828_v14 = vrot.slane %v3112_v51, 1 }
  0x4f   : > { %2445 = vmatpush3.bf16.msra.mxu1 %v2733_v33  ;;  %v821_v42 = vsel %vm818_vm0, %v819_v38, %v820_v16  ;;  %v2736_v33 = vld [vmem:[%s3511_s1 + $0x198] sm:$0xff]   ;;  %v467_v16 = vadd.f32 %v2882_v29, %v394_v21  ;;  %v500_v43 = vmax.f32 %v449_v4, 0.0  ;;  %v829_v25 = vrot.slane %v506_v36, 1  ;;  %v2740_v4 = vld [vmem:[%s3511_s1 + $0x1a8] sm:$0xff]  }
  0x50   : > { %2446 = vmatprep.subr.bf16.mxu1 %v2735_v0  ;;  %v851_v38 = vpack.c.bf16 %v3285_v48, %v821_v42  ;;  %2533 = vmatmul.mubr.bf16.gmra.mrb[4].mxu0 %v1328_v5  ;;  %v512_v5 = vmax.f32 %v461_v15, 0.0  ;;  %v406_v6 = vmul.f32 %v2876_v26, %v333_v28  ;;  %v400_v24 = vmul.f32 %v2876_v26, %v327_v53 }
  0x51   : > { %2541 = vmatpush3.bf16.msra.mxu0 %v2734_v18  ;;  %v2741_v18 = vld [vmem:[%s3511_s1 + $0xb0] sm:$0xff]   ;;  %2552 = vmatprep.mubr.bf16.mxu0 %v1467_v9  ;;  %v408_v54 = vmul.f32 %v2876_v26, %v335_v58  ;;  %v410_v42 = vmul.f32 %v2876_v26, %v337_v55  ;;  %v518_v60 = vmax.f32 %v467_v16, 0.0  ;;  %v3318_v21 = vpack.c.bf16 %v497_v20, %v491_v59  ;;  %v2743_v20 = vld [vmem:[%s3511_s1 + $0xb8] sm:$0xff]  }
  0x52   : > { %2542 = vmatprep.subr.bf16.mxu0 %v2736_v33  ;;  %2456 = vmatprep.mubr.bf16.mxu1 %v851_v38  ;;  %v832_v36 = vrot.slane %v512_v5, 1  ;;  %v479_v1 = vadd.f32 %v2882_v29, %v406_v6  ;;  %v825_v38 = vrot.slane %v2997_v49, 1  ;;  %v826_v26 = vrot.slane %v500_v43, 1 }
  0x53   : > { %2447 = vmatpush3.bf16.msra.mxu1 %v2735_v0  ;;  %v2738_v0 = vld [vmem:[%s3511_s1 + $0x1a0] sm:$0xff]   ;;  %v483_v9 = vadd.f32 %v2882_v29, %v410_v42  ;;  %v3326_v53 = vsel %vm818_vm0, %v828_v14, %v829_v25  ;;  %v834_v59 = vrot.slane %v3162_v31, 1  ;;  %v840_v15 = vrot.slane %v3218_v44, 1 }
  0x54   : > { %2448 = vmatprep.subr.bf16.mxu1 %v2737_v56  ;;  %v3329_v50 = vsel %vm818_vm0, %v831_v46, %v832_v36  ;;  %v530_v11 = vmax.f32 %v479_v1, 0.0  ;;  %v835_v16 = vrot.slane %v518_v60, 1  ;;  %v473_v58 = vadd.f32 %v2882_v29, %v400_v24  ;;  %v2745_v24 = vld [vmem:[%s3511_s1 + $0xc0] sm:$0xff]  }
  0x55   : > { %2543 = vmatpush3.bf16.msra.mxu0 %v2736_v33  ;;  %v1758_v49 = vpack.c.bf16 %v3329_v50, %v3326_v53  ;;  %v534_v28 = vmax.f32 %v483_v9, 0.0  ;;  %v3519_v43 = vmax.f32 %v3046_v39, 0.0  ;;  %v3347_v25 = vsel %vm818_vm0, %v825_v38, %v826_v26  ;;  %v2746_v9 = vld [vmem:[%s3511_s1 + $0x1c0] sm:$0xff]  }
  0x56   : > { %2544 = vmatprep.subr.bf16.mxu0 %v2738_v0  ;;  %v841_v55 = vrot.slane %v530_v11, 1  ;;  %v1757_v10 = vpack.c.bf16 %v3347_v25, %v3285_v48  ;;  %v524_v6 = vmax.f32 %v473_v58, 0.0  ;;  %v837_v36 = vrot.slane %v3212_v35, 1  ;;  %v2760_v58 = vld [vmem:[%s3511_s1 + $0x1f8] sm:$0xff]  }
  0x57   : > { %2449 = vmatpush3.bf16.msra.mxu1 %v2737_v56  ;;  %v3322_v56 = vadd.f32 %v2882_v29, %v408_v54  ;;  %v3344_v14 = vpack.c.bf16 %v3519_v43, %v515_v37  ;;  %v1754_v46 = vrot.slane %v534_v28, 1  ;;  %v2742_v29 = vld [vmem:[%s3511_s1 + $0x1b0] sm:$0xff]   ;;  %v3370_v54 = vsel %vm818_vm0, %v834_v59, %v835_v16  ;;  %v2761_v16 = vld [vmem:[%s3511_s1 + $0x200] sm:$0xff]  }
  0x58   : > { %2450 = vmatprep.subr.bf16.mxu1 %v2739_v62  ;;  %v3358_v37 = vsel %vm818_vm0, %v840_v15, %v841_v55  ;;  %v838_v1 = vrot.slane %v524_v6, 1  ;;  %v3520_v38 = vmax.f32 %v3062_v3, 0.0  ;;  %v1468_v59 = vpack.c.bf16 %v3156_v12, %v3112_v51  ;;  %v2749_v3 = vld [vmem:[%s3511_s1 + $0xd0] sm:$0xff]   ;;  %v2751_v15 = vld [vmem:[%s3511_s1 + $0xd8] sm:$0xff]  }
  0x59   : > { %v532_v33 = vmax.f32 %v3322_v56, 0.0  ;;  %2545 = vmatpush3.bf16.msra.mxu0 %v2738_v0  ;;  %v1469_v28 = vpack.c.bf16 %v3212_v35, %v3162_v31  ;;  %v993_v12 = vpack.c.bf16 %v492_v30, %v486_v22  ;;  %v2750_v31 = vld [vmem:[%s3511_s1 + $0x1d0] sm:$0xff]   ;;  %v2752_v22 = vld [vmem:[%s3511_s1 + $0x1d8] sm:$0xff]   ;;  %v2755_v30 = vld [vmem:[%s3511_s1 + $0xe8] sm:$0xff]   ;;  %v994_v55 = vpack.c.bf16 %v504_v57, %v498_v52 }
  0x5a   : > { %2546 = vmatprep.subr.bf16.mxu0 %v2740_v4  ;;  %v3394_v11 = vsel %vm818_vm0, %v837_v36, %v838_v1  ;;  %v2754_v35 = vld [vmem:[%s3511_s1 + $0x1e0] sm:$0xff]   ;;  %v2756_v56 = vld [vmem:[%s3511_s1 + $0x1e8] sm:$0xff]   ;;  %v995_v43 = vpack.c.bf16 %v516_v17, %v510_v13  ;;  %v2764_v57 = vld [vmem:[%s3511_s1 + $0x218] sm:$0xff]  }
  0x5b   : > { %2451 = vmatpush3.bf16.msra.mxu1 %v2739_v62  ;;  %v1753_v5 = vrot.slane %v532_v33, 1  ;;  %v336_v62 = vunpack.c.h.bf16 %v3278_v8  ;;  %v854_v51 = vpack.c.bf16 %v3358_v37, %v3394_v11  ;;  %v1470_v61 = vpack.c.bf16 %v532_v33, %v3218_v44  ;;  %v2757_v44 = vld [vmem:[%s3511_s1 + $0xf0] sm:$0xff]   ;;  %v2759_v33 = vld [vmem:[%s3511_s1 + $0xf8] sm:$0xff]  }
  0x5c   : > { %2452 = vmatprep.subr.bf16.mxu1 %v2741_v18  ;;  %v1759_v52 = vpack.c.bf16 %v3394_v11, %v3370_v54  ;;  %v2768_v13 = vld [vmem:[%s3511_s1 + $0x238] sm:$0xff]  }
  0x5d   : > { %v3361_v39 = vsel %vm818_vm0, %v1753_v5, %v1754_v46  ;;  %v409_v0 = vmul.f32 %v2878_v27, %v336_v62  ;;  %2547 = vmatpush3.bf16.msra.mxu0 %v2740_v4  ;;  %v2744_v27 = vld [vmem:[%s3511_s1 + $0x1b8] sm:$0xff]   ;;  %v853_v4 = vpack.c.bf16 %v3370_v54, %v3329_v50  ;;  %v2762_v5 = vld [vmem:[%s3511_s1 + $0x208] sm:$0xff]  }
  0x5e   : > { %v1760_v8 = vpack.c.bf16 %v3361_v39, %v3358_v37  ;;  %2548 = vmatprep.subr.bf16.mxu0 %v2742_v29 }
  0x5f   : > { %2453 = vmatpush3.bf16.msra.mxu1 %v2741_v18  ;;  %v482_v42 = vadd.f32 %v2886_v32, %v409_v0  ;;  %v852_v18 = vpack.c.bf16 %v3326_v53, %v3347_v25  ;;  %v2747_v32 = vld [vmem:[%s3511_s1 + $0xc8] sm:$0xff]   ;;  %v2240_v53 = vld [vmem:[%s3514_s4] ss:$0 sm:$0xff] }
  0x60   : > { %2454 = vmatprep.subr.bf16.mxu1 %v2743_v20 }
  0x61   : > { %v533_v60 = vmax.f32 %v482_v42, 0.0  ;;  %2549 = vmatpush3.bf16.msra.mxu0 %v2742_v29 }
  0x62   : > { %2550 = vmatprep.subr.bf16.mxu0 %v2744_v27 }
  0x63   : > { %2455 = vmatpush3.bf16.msra.mxu1 %v2743_v20  ;;  %v3386_v26 = vpack.c.bf16 %v533_v60, %v3520_v38  ;;  %v2748_v20 = vld [vmem:[%s3511_s1 + $0x1c8] sm:$0xff]  }
  0x64   : > { %2464 = vmatprep.subr.bf16.mxu1 %v2745_v24 }
  0x65   : > { %2551 = vmatpush3.bf16.msra.mxu0 %v2744_v27 }
  0x66   : > { %2457 = vmatmul.mubr.bf16.vlgmr.msra.gmra.mrb[0].mxu1 %v852_v18  ;;  %2560 = vmatprep.subr.bf16.mxu0 %v2746_v9 }
  0x67   : > { %2465 = vmatpush3.bf16.msra.mxu1 %v2745_v24  ;;  %2460 = vmatprep.mubr.bf16.mxu1 %v853_v4  ;;  %v2241_v24 = vld [vmem:[%s3515_s5] ss:$0 sm:$0xff] }
  0x68   : > { %2466 = vmatprep.subr.bf16.mxu1 %v2747_v32  ;;  %2553 = vmatmul.mubr.bf16.vlgmr.msra.gmra.mrb[0].mxu0 %v1468_v59 }
  0x69   : > { %2561 = vmatpush3.bf16.msra.mxu0 %v2746_v9  ;;  %2556 = vmatprep.mubr.bf16.mxu0 %v1469_v28 }
  0x6a   : > { %2562 = vmatprep.subr.bf16.mxu0 %v2748_v20 }
  0x6b   : > { %2467 = vmatpush3.bf16.msra.mxu1 %v2747_v32 }
  0x6c   : > { %2468 = vmatprep.subr.bf16.mxu1 %v2749_v3 }
  0x6d   : > { %2563 = vmatpush3.bf16.msra.mxu0 %v2748_v20 }
  0x6e   : > { %2461 = vmatmul.mubr.bf16.gmra.mrb[4].mxu1 %v854_v51  ;;  %2564 = vmatprep.subr.bf16.mxu0 %v2750_v31 }
  0x6f   : > { %2469 = vmatpush3.bf16.msra.mxu1 %v2749_v3  ;;  %2480 = vmatprep.mubr.bf16.mxu1 %v993_v12 }
  0x70   : > { %2470 = vmatprep.subr.bf16.mxu1 %v2751_v15  ;;  %2557 = vmatmul.mubr.bf16.gmra.mrb[4].mxu0 %v1470_v61 }
  0x71   : > { %2565 = vmatpush3.bf16.msra.mxu0 %v2750_v31  ;;  %2576 = vmatprep.mubr.bf16.mxu0 %v3318_v21  ;;  %v2758_v21 = vld [vmem:[%s3511_s1 + $0x1f0] sm:$0xff]  }
  0x72   : > { %2566 = vmatprep.subr.bf16.mxu0 %v2752_v22 }
  0x73   : > { %2471 = vmatpush3.bf16.msra.mxu1 %v2751_v15 }
  0x74   : > { %2472 = vmatprep.subr.bf16.mxu1 %v2753_v7 }
  0x75   : > { %2567 = vmatpush3.bf16.msra.mxu0 %v2752_v22 }
  0x76   : > { %2568 = vmatprep.subr.bf16.mxu0 %v2754_v35 }
  0x77   : > { %2473 = vmatpush3.bf16.msra.mxu1 %v2753_v7 }
  0x78   : > { %2474 = vmatprep.subr.bf16.mxu1 %v2755_v30 }
  0x79   : > { %2569 = vmatpush3.bf16.msra.mxu0 %v2754_v35 }
  0x7a   : > { %2570 = vmatprep.subr.bf16.mxu0 %v2756_v56 }
  0x7b   : > { %2475 = vmatpush3.bf16.msra.mxu1 %v2755_v30 }
  0x7c   : > { %2476 = vmatprep.subr.bf16.mxu1 %v2757_v44 }
  0x7d   : > { %2571 = vmatpush3.bf16.msra.mxu0 %v2756_v56 }
  0x7e   : > { %2572 = vmatprep.subr.bf16.mxu0 %v2758_v21 }
  0x7f   : > { %2477 = vmatpush3.bf16.msra.mxu1 %v2757_v44 }
  0x80   : > { %2478 = vmatprep.subr.bf16.mxu1 %v2759_v33 }
  0x81   : > { %2573 = vmatpush3.bf16.msra.mxu0 %v2758_v21 }
  0x82   : > { %2574 = vmatprep.subr.bf16.mxu0 %v2760_v58 }
  0x83   : > { %2479 = vmatpush3.bf16.msra.mxu1 %v2759_v33 }
  0x84   : > { %2608 = vmatprep.subr.bf16.mxu1 %v2761_v16 }
  0x85   : > { %2575 = vmatpush3.bf16.msra.mxu0 %v2760_v58 }
  0x86   : > { %2481 = vmatmul.mubr.bf16.vlgmr.msra.gmra.mrb[0].mxu1 %v994_v55  ;;  %2584 = vmatprep.subr.bf16.mxu0 %v2761_v16 }
  0x87   : > { %2616 = vmatpush3.bf16.msra.mxu1 %v2761_v16  ;;  %2484 = vmatprep.mubr.bf16.mxu1 %v995_v43 }
  0x88   : > { %2609 = vmatprep.subr.bf16.mxu1 %v2762_v5  ;;  %2577 = vmatmul.mubr.bf16.vlgmr.msra.gmra.mrb[0].mxu0 %v3053_v19  ;;  %v2765_v19 = vld [vmem:[%s3511_s1 + $0x220] sm:$0xff]  }
  0x89   : > { %2585 = vmatpush3.bf16.msra.mxu0 %v2761_v16  ;;  %2580 = vmatprep.mubr.bf16.mxu0 %v3344_v14 }
  0x8a   : > { %2586 = vmatprep.subr.bf16.mxu0 %v2762_v5 }
  0x8b   : > { %2617 = vmatpush3.bf16.msra.mxu1 %v2762_v5 }
  0x8c   : > { %2610 = vmatprep.subr.bf16.mxu1 %v2763_v34 }
  0x8d   : > { %2587 = vmatpush3.bf16.msra.mxu0 %v2762_v5 }
  0x8e   : > { %2485 = vmatmul.mubr.bf16.gmra.mrb[4].mxu1 %v996_v40  ;;  %2588 = vmatprep.subr.bf16.mxu0 %v2763_v34 }
  0x8f   : > { %2618 = vmatpush3.bf16.msra.mxu1 %v2763_v34  ;;  %2604 = vmatprep.mubr.bf16.mxu1 %v1759_v52 }
  0x90   : > { %2611 = vmatprep.subr.bf16.mxu1 %v2764_v57  ;;  %2581 = vmatmul.mubr.bf16.gmra.mrb[4].mxu0 %v3386_v26 }
  0x91   : > { %2589 = vmatpush3.bf16.msra.mxu0 %v2763_v34  ;;  %2600 = vmatprep.mubr.bf16.mxu0 %v1757_v10 }
  0x92   : > { %2590 = vmatprep.subr.bf16.mxu0 %v2764_v57 }
  0x93   : > { %2619 = vmatpush3.bf16.msra.mxu1 %v2764_v57 }
  0x94   : > { %2612 = vmatprep.subr.bf16.mxu1 %v2765_v19 }
  0x95   : > { %2591 = vmatpush3.bf16.msra.mxu0 %v2764_v57 }
  0x96   : > { %2592 = vmatprep.subr.bf16.mxu0 %v2765_v19 }
  0x97   : > { %2620 = vmatpush3.bf16.msra.mxu1 %v2765_v19 }
  0x98   : > { %2613 = vmatprep.subr.bf16.mxu1 %v2766_v45 }
  0x99   : > { %2593 = vmatpush3.bf16.msra.mxu0 %v2765_v19 }
  0x9a   : > { %2594 = vmatprep.subr.bf16.mxu0 %v2766_v45 }
  0x9b   : > { %2621 = vmatpush3.bf16.msra.mxu1 %v2766_v45 }
  0x9c   : > { %2614 = vmatprep.subr.bf16.mxu1 %v2767_v23 }
  0x9d   : > { %2595 = vmatpush3.bf16.msra.mxu0 %v2766_v45 }
  0x9e   : > { %2596 = vmatprep.subr.bf16.mxu0 %v2767_v23 }
  0x9f   : > { %2622 = vmatpush3.bf16.msra.mxu1 %v2767_v23 }
  0xa0   : > { %2615 = vmatprep.subr.bf16.mxu1 %v2768_v13 }
  0xa1   : > { %2597 = vmatpush3.bf16.msra.mxu0 %v2767_v23 }
  0xa2   : > { %2598 = vmatprep.subr.bf16.mxu0 %v2768_v13 }
  0xa3   : > { %2623 = vmatpush3.bf16.msra.mxu1 %v2768_v13 }
  0xa5   : > { %2599 = vmatpush3.bf16.msra.mxu0 %v2768_v13 }
  0xa6   : > { %2605 = vmatmul.mubr.bf16.vlgmr.msra.gmra.mrb[8].mxu1 %v1760_v8 }
  0xa8   : > { %2601 = vmatmul.mubr.bf16.vlgmr.msra.gmra.mrb[0].mxu0 %v1758_v49 }
 0x159   : > { %v2482_v17 = vpop.f32.mrb[0].mxu1 }
 0x15a   : > { %v1096_v41 = vpop.f32.mrb[1].mxu1 }
 0x15b   : > { %v2483_v47 = vpop.f32.mrb[2].mxu1 }
 0x15c   : > { %v1099_v2 = vpop.f32.mrb[3].mxu1 }
 0x161   : > { %v2486_v63 = vpop.f32.mrb[4].mxu1 }
 0x162   : > { %v1112_v48 = vpop.f32.mrb[5].mxu1 }
 0x163   : > { %v2487_v14 = vpop.f32.mrb[6].mxu1  ;;  %v2582_v46 = vpop.f32.mrb[4].mxu0 }
 0x164   : > { %v1115_v25 = vpop.f32.mrb[7].mxu1  ;;  %v2628_v62 = vadd.f32 %v2582_v46, %v2486_v63  ;;  %v1728_v29 = vpop.f32.mrb[5].mxu0 }
 0x165   : > { %v2630_v10 = vadd.f32 %v1728_v29, %v1112_v48  ;;  %v2583_v0 = vpop.f32.mrb[6].mxu0 }
 0x166   : > { %v2632_v37 = vadd.f32 %v2583_v0, %v2487_v14  ;;  %v1731_v39 = vpop.f32.mrb[7].mxu0 }
 0x167   : > { %v2634_v6 = vadd.f32 %v1731_v39, %v1115_v25 }
 0x179   : > { %v2606_v50 = vpop.f32.mrb[8].mxu1 }
 0x17a   : > { %v2629_v49 = vadd.f32 %v2628_v62, %v2606_v50  ;;  %v1876_v8 = vpop.f32.mrb[9].mxu1 }
 0x17b   : > { %v2631_v54 = vadd.f32 %v2630_v10, %v1876_v8  ;;  %v2607_v42 = vpop.f32.mrb[10].mxu1  ;;  %v2602_v1 = vpop.f32.mrb[0].mxu0 }
 0x17c   : > { %v1912_v27 = vmul.f32 %v2629_v49, %v2240_v53  ;;  %v2633_v18 = vadd.f32 %v2632_v37, %v2607_v42  ;;  %v1879_v60 = vpop.f32.mrb[11].mxu1  ;;  %v2624_v26 = vadd.f32 %v2602_v1, %v2482_v17  ;;  %v1860_v9 = vpop.f32.mrb[1].mxu0 }
 0x17d   : > { %v1910_v4 = vmul.f32 %v2631_v54, %v2240_v53  ;;  %v2635_v36 = vadd.f32 %v2634_v6, %v1879_v60  ;;  %v2625_v3 = vadd.f32 %v1860_v9, %v1096_v41  ;;  %v2603_v20 = vpop.f32.mrb[2].mxu0 }
 0x17e   : > { %v1927_v32 = vadd.f32 %v2241_v24, %v1912_v27  ;;  %v1913_v38 = vmul.f32 %v2633_v18, %v2240_v53  ;;  %v1908_v51 = vmul.f32 %v2624_v26, %v2240_v53  ;;  %v2626_v12 = vadd.f32 %v2603_v20, %v2483_v47  ;;  %v1863_v15 = vpop.f32.mrb[3].mxu0 }
 0x17f   : > { %v1925_v59 = vadd.f32 %v2241_v24, %v1910_v4  ;;  %v1911_v11 = vmul.f32 %v2635_v36, %v2240_v53  ;;  %v1906_v7 = vmul.f32 %v2625_v3, %v2240_v53  ;;  %v2627_v30 = vadd.f32 %v1863_v15, %v1099_v2 }
 0x180   : > { %v1928_v28 = vadd.f32 %v2241_v24, %v1913_v38  ;;  %v1935_v61 = vmax.f32 %v1927_v32, 0.0  ;;  %v1923_v35 = vadd.f32 %v2241_v24, %v1908_v51  ;;  %v1909_v56 = vmul.f32 %v2626_v12, %v2240_v53 }
 0x181   : > { %v1926_v31 = vadd.f32 %v2241_v24, %v1911_v11  ;;  %v1933_v44 = vmax.f32 %v1925_v59, 0.0  ;;  %v1921_v21 = vadd.f32 %v2241_v24, %v1906_v7  ;;  %v1907_v58 = vmul.f32 %v2627_v30, %v2240_v53 }
 0x182   : > { %v1936_v22 = vmax.f32 %v1928_v28, 0.0  ;;  %v1924_v55 = vadd.f32 %v2241_v24, %v1909_v56  ;;  %v1931_v34 = vmax.f32 %v1923_v35, 0.0 }
 0x183   : > { %v1934_v33 = vmax.f32 %v1926_v31, 0.0  ;;  %v1922_v5 = vadd.f32 %v2241_v24, %v1907_v58  ;;  %v1929_v52 = vmax.f32 %v1921_v21, 0.0 }
 0x184   : > { %v2279_v16 = vpack.c.bf16 %v1936_v22, %v1935_v61  ;;  %v1932_v40 = vmax.f32 %v1924_v55, 0.0 }
 0x185   : > { %v2274_v43 = vpack.c.bf16 %v1934_v33, %v1933_v44  ;;  %v1930_v57 = vmax.f32 %v1922_v5, 0.0 }
 0x186   : > { %2283 = vst [vmem:[%s251_s30 + $0x18] sm:$0xff] %v2279_v16   ;;  %v2269_v19 = vpack.c.bf16 %v1932_v40, %v1931_v34 }
 0x187   : > { %2282 = vst [vmem:[%s251_s30 + $0x10] sm:$0xff] %v2274_v43   ;;  %v2264_v45 = vpack.c.bf16 %v1930_v57, %v1929_v52 }
 0x188   : > { %2281 = vst [vmem:[%s251_s30 + $0x8] sm:$0xff] %v2269_v19  }
 0x189   : > { %2265 = vst [vmem:[%s251_s30] sm:$0xff] %v2264_v45  }
 0x18a PF: > { %s16_s21 = sadd.s32 1, %s2775_s21  }
 0x18b   : > { %p13_p4 = scmp.ge.s32.totalorder %s16_s21, 4  }
 0x18d   :  { %15 = sbr.rel (!%p13_p4) target bundleno = 1 (0x1), region = 82 }

</bundles_post_ra>
